<compile_context>
chip_gen: v7x
topology: tpu7x:2x2x1
jax: 0.10.0
libtpu: 0.0.40
codegen_flags: <defaults>
</compile_context>

<pallas_src>
import jax
import jax.numpy as jnp
import numpy as np
from jax.experimental import pallas as pl
from jax.experimental.pallas import tpu as pltpu

_VMEM = pl.BlockSpec(memory_space=pltpu.MemorySpace.VMEM)

_OUT_PAD = 128      # classifier output padded (once, in make_params) to 128 lanes


# ----------------------------------------------------------------------------
# Single fused kernel: mask weighting + classification head.
# ----------------------------------------------------------------------------
def cdmodel_kernel(mask_ref, lw_ref,                  # pixel path
                   v_ref, q_ref, t_ref,               # pooled features
                   wv_ref, bv_ref, wq_ref, bq_ref,    # lineV / lineQ
                   w1_ref, b1_ref, w2_ref, b2_ref,    # classifier MLP
                   pmask_ref, out_ref):               # outputs
    # ---- pixel path: predict_mask = maskNet(input_v) * self.weights --------
    # mask_ref : (B, 3*H*W) f32, lw_ref : (1, 3*H*W) f32 (lane-dense)
    pmask_ref[...] = mask_ref[...] * lw_ref[...]
    # TODO(synk): v_img = input_v + predict_mask[:, 2] only feeds the external
    #             pretrained imgModel (its pooled output v_pool is a synthetic
    #             input here), so it is intentionally not computed.

    bf16 = jnp.bfloat16

    # ---- fusion head (dropout == identity in eval mode) ---------------------
    # v = tanh(lineV(v_pool))
    v = jnp.tanh(jnp.dot(v_ref[...].astype(bf16), wv_ref[...],
                         preferred_element_type=jnp.float32) + bv_ref[...])
    # q = tanh(lineQ(q_pool)) + t        (t = textEnhance(m0, m1), external)
    q = jnp.tanh(jnp.dot(q_ref[...].astype(bf16), wq_ref[...],
                         preferred_element_type=jnp.float32) + bq_ref[...])
    q = q + t_ref[...]
    # x = tanh(v * q)
    x = jnp.tanh(v * q)
    # x = tanh(linear_classify1(x))
    x = jnp.tanh(jnp.dot(x.astype(bf16), w1_ref[...],
                         preferred_element_type=jnp.float32) + b1_ref[...])
    # logits = linear_classify2(x)      (output lanes pre-padded to 128)
    out_ref[...] = jnp.dot(x.astype(bf16), w2_ref[...],
                           preferred_element_type=jnp.float32) + b2_ref[...]


# ----------------------------------------------------------------------------
# Wrapper: no per-call padding — full-array blocks, single pallas_call.
# ----------------------------------------------------------------------------
def cdmodel_forward(params, input_v, mask_raw, v_pool, q_pool, t_feat,
                    *, num_classes):
    """addMask branch of CDModel.forward (eval mode).

    input_v is accepted for signature fidelity but only consumed by the
    external pretrained imgModel (whose pooled output is the synthetic
    `v_pool`), so it is unused here.
    """
    del input_v
    B, C, H, W = mask_raw.shape
    CHW = C * H * W

    # Lane-dense pixel layout: (B,3,H,W) -> (B, 3*H*W).  Free (contiguous).
    mask2d = mask_raw.reshape(B, CHW)

    # Advisory cost for XLA's scheduler around this custom call.
    d_in_v, d_in_q, d_fuse, d_hid = 768, 512, 768, params["W1"].shape[1]
    flops = 2 * B * (d_in_v * 768 + d_in_q * 768 + d_fuse * d_hid
                     + d_hid * _OUT_PAD) + 4 * B * CHW
    transcendentals = B * (3 * 768 + d_hid)
    weight_bytes = 2 * (d_in_v * 768 + d_in_q * 768 + d_fuse * d_hid
                        + d_hid * _OUT_PAD)            # bf16 weights
    bias_bytes = 4 * (768 + 768 + d_hid + _OUT_PAD)
    act_bytes = 4 * (2 * B * CHW + CHW                 # mask in/out + learn_w
                     + B * (768 + 512 + 768)           # pooled features
                     + B * _OUT_PAD)                   # logits
    cost = pl.CostEstimate(flops=flops, transcendentals=transcendentals,
                           bytes_accessed=weight_bytes + bias_bytes + act_bytes)

    pmask2d, logits_p = pl.pallas_call(
        cdmodel_kernel,
        out_shape=(jax.ShapeDtypeStruct((B, CHW), jnp.float32),
                   jax.ShapeDtypeStruct((B, _OUT_PAD), jnp.float32)),
        in_specs=[_VMEM] * 13,
        out_specs=(_VMEM, _VMEM),
        cost_estimate=cost,
    )(mask2d, params["learn_w_flat"], v_pool, q_pool, t_feat,
      params["Wv"], params["bv"], params["Wq"], params["bq"],
      params["W1"], params["b1"], params["W2p"], params["b2p"])

    predict_mask = pmask2d.reshape(B, C, H, W)
    logits = logits_p[:, :num_classes]
    return logits, predict_mask


# ----------------------------------------------------------------------------
# Pure-JAX reference (same bf16-at-dot recipe) for correctness checking.
# ----------------------------------------------------------------------------
def cdmodel_reference(params, mask_raw, v_pool, q_pool, t_feat, num_classes):
    bf16 = jnp.bfloat16

    def lin(x, w, b):
        return jnp.dot(x.astype(bf16), w.astype(bf16),
                       preferred_element_type=jnp.float32) + b

    pm = mask_raw * params["learn_w"][None]
    v = jnp.tanh(lin(v_pool, params["Wv"], params["bv"]))
    q = jnp.tanh(lin(q_pool, params["Wq"], params["bq"])) + t_feat
    x = jnp.tanh(v * q)
    x = jnp.tanh(lin(x, params["W1"], params["b1"]))
    logits = lin(x, params["W2p"], params["b2p"])[:, :num_classes]
    return logits, pm


# ----------------------------------------------------------------------------
# Deterministic, KERNEL-READY parameter construction (one-time prep):
#   * matmul weights stored bf16 (streamed as bf16), biases f32
#   * classifier W2/b2 zero-padded to 128 output lanes HERE (not per-call)
#   * learnable mask weights also stored lane-dense as (1, 3*H*W)
# ----------------------------------------------------------------------------
def make_params(key, input_size, fusion_in, fusion_hidden, num_classes):
    ks = jax.random.split(key, 5)

    def linear_init(k, fin, fout):
        k1, k2 = jax.random.split(k)
        bound = 1.0 / jnp.sqrt(fin)
        w = jax.random.uniform(k1, (fin, fout), jnp.float32, -bound, bound)
        b = jax.random.uniform(k2, (1, fout), jnp.float32, -bound, bound)
        return w.astype(jnp.bfloat16), b

    params = {}
    # self.weights = nn.Parameter(torch.randn(3, input_size, input_size) + 1)
    params["learn_w"] = jax.random.normal(
        ks[0], (3, input_size, input_size), jnp.float32) + 1.0
    params["learn_w_flat"] = params["learn_w"].reshape(1, 3 * input_size * input_size)
    params["Wv"], params["bv"] = linear_init(ks[1], 768, 768)            # lineV
    params["Wq"], params["bq"] = linear_init(ks[2], 512, 768)            # lineQ
    params["W1"], params["b1"] = linear_init(ks[3], fusion_in, fusion_hidden)
    w2, b2 = linear_init(ks[4], fusion_hidden, num_classes)              # classifier2
    params["W2p"] = jnp.pad(w2, ((0, 0), (0, _OUT_PAD - num_classes)))
    params["b2p"] = jnp.pad(b2, ((0, 0), (0, _OUT_PAD - num_classes)))
    return params


if __name__ == "__main__":
    B, H = 2, 16                           # batch, spatial (input_size)
    FUSION_IN, FUSION_HIDDEN, NUM_CLASSES = 768, 256, 8

    key = jax.random.PRNGKey(0)
    kp, k0, k1, k2, k3, k4 = jax.random.split(key, 6)

    params = make_params(kp, H, FUSION_IN, FUSION_HIDDEN, NUM_CLASSES)

    input_v = jax.random.normal(k0, (B, 3, H, H), jnp.float32)   # NCHW pixels
    mask_raw = jax.random.normal(k1, (B, 3, H, H), jnp.float32)  # maskNet(input_v)
    v_pool = jax.random.normal(k2, (B, 768), jnp.float32)        # imgModel pooler
    q_pool = jax.random.normal(k3, (B, 512), jnp.float32)        # textModel pooler
    t_feat = jax.random.normal(k4, (B, 768), jnp.float32)        # textEnhance(m0, m1)

    fwd = jax.jit(cdmodel_forward, static_argnames=("num_classes",))
    logits, predict_mask = fwd(params, input_v, mask_raw, v_pool, q_pool, t_feat,
                               num_classes=NUM_CLASSES)
    jax.block_until_ready((logits, predict_mask))

    assert logits.shape == (B, NUM_CLASSES)
    assert predict_mask.shape == (B, 3, H, H)

    ref_logits, ref_pm = cdmodel_reference(params, mask_raw, v_pool, q_pool,
                                           t_feat, NUM_CLASSES)
    np.testing.assert_allclose(np.asarray(predict_mask), np.asarray(ref_pm),
                               rtol=1e-5, atol=1e-5)
    np.testing.assert_allclose(np.asarray(logits), np.asarray(ref_logits),
                               rtol=5e-2, atol=5e-2)
    print("KERNEL_OK")
</pallas_src>

<mosaic_0001>
module attributes {stable_mosaic.version = 11 : i64} {
  func.func @cdmodel_kernel(%arg0: memref<2x768xf32, #tpu.memory_space<vmem>>, %arg1: memref<1x768xf32, #tpu.memory_space<vmem>>, %arg2: memref<2x768xf32, #tpu.memory_space<vmem>>, %arg3: memref<2x512xf32, #tpu.memory_space<vmem>>, %arg4: memref<2x768xf32, #tpu.memory_space<vmem>>, %arg5: memref<768x768xbf16, #tpu.memory_space<vmem>>, %arg6: memref<1x768xf32, #tpu.memory_space<vmem>>, %arg7: memref<512x768xbf16, #tpu.memory_space<vmem>>, %arg8: memref<1x768xf32, #tpu.memory_space<vmem>>, %arg9: memref<768x256xbf16, #tpu.memory_space<vmem>>, %arg10: memref<1x256xf32, #tpu.memory_space<vmem>>, %arg11: memref<256x128xbf16, #tpu.memory_space<vmem>>, %arg12: memref<1x128xf32, #tpu.memory_space<vmem>>, %arg13: memref<2x768xf32, #tpu.memory_space<vmem>>, %arg14: memref<2x128xf32, #tpu.memory_space<vmem>>) attributes {dimension_semantics = [], scalar_prefetch = 0 : i64, scratch_operands = 0 : i64, tpu.core_type = #tpu.core_type<tc>} {
    %c0 = arith.constant 0 : index
    %c0_0 = arith.constant 0 : index
    %0 = vector.load %arg0[%c0, %c0_0] : memref<2x768xf32, #tpu.memory_space<vmem>>, vector<2x768xf32>
    %c0_1 = arith.constant 0 : index
    %c0_2 = arith.constant 0 : index
    %1 = vector.load %arg1[%c0_1, %c0_2] : memref<1x768xf32, #tpu.memory_space<vmem>>, vector<1x768xf32>
    %2 = vector.broadcast %1 : vector<1x768xf32> to vector<2x768xf32>
    %3 = arith.mulf %0, %2 : vector<2x768xf32>
    %c0_3 = arith.constant 0 : index
    %c0_4 = arith.constant 0 : index
    %4 = vector.load %arg13[%c0_3, %c0_4] : memref<2x768xf32, #tpu.memory_space<vmem>>, vector<2x768xf32>
    tpu.vector_store %arg13[%c0_3, %c0_4], %3 {strides = array<i32>} : memref<2x768xf32, #tpu.memory_space<vmem>>, vector<2x768xf32>,
    %c0_5 = arith.constant 0 : index
    %c0_6 = arith.constant 0 : index
    %5 = vector.load %arg2[%c0_5, %c0_6] : memref<2x768xf32, #tpu.memory_space<vmem>>, vector<2x768xf32>
    %6 = arith.truncf %5 : vector<2x768xf32> to vector<2x768xbf16>
    %c0_7 = arith.constant 0 : index
    %c0_8 = arith.constant 0 : index
    %7 = vector.load %arg5[%c0_7, %c0_8] : memref<768x768xbf16, #tpu.memory_space<vmem>>, vector<768x768xbf16>
    %cst = arith.constant dense<0.000000e+00> : vector<2x768xf32>
    %8 = tpu.matmul %6, %7, %cst {dimension_numbers = #tpu.dot_dimension_numbers<[1], [0], [0], [1], [0, 0, 1, 1], [], []>} : vector<2x768xbf16>, vector<768x768xbf16>, vector<2x768xf32> -> vector<2x768xf32>
    %c0_9 = arith.constant 0 : index
    %c0_10 = arith.constant 0 : index
    %9 = vector.load %arg6[%c0_9, %c0_10] : memref<1x768xf32, #tpu.memory_space<vmem>>, vector<1x768xf32>
    %10 = vector.broadcast %9 : vector<1x768xf32> to vector<2x768xf32>
    %11 = arith.addf %8, %10 : vector<2x768xf32>
    %12 = math.tanh %11 : vector<2x768xf32>
    %c0_11 = arith.constant 0 : index
    %c0_12 = arith.constant 0 : index
    %13 = vector.load %arg3[%c0_11, %c0_12] : memref<2x512xf32, #tpu.memory_space<vmem>>, vector<2x512xf32>
    %14 = arith.truncf %13 : vector<2x512xf32> to vector<2x512xbf16>
    %c0_13 = arith.constant 0 : index
    %c0_14 = arith.constant 0 : index
    %15 = vector.load %arg7[%c0_13, %c0_14] : memref<512x768xbf16, #tpu.memory_space<vmem>>, vector<512x768xbf16>
    %cst_15 = arith.constant dense<0.000000e+00> : vector<2x768xf32>
    %16 = tpu.matmul %14, %15, %cst_15 {dimension_numbers = #tpu.dot_dimension_numbers<[1], [0], [0], [1], [0, 0, 1, 1], [], []>} : vector<2x512xbf16>, vector<512x768xbf16>, vector<2x768xf32> -> vector<2x768xf32>
    %c0_16 = arith.constant 0 : index
    %c0_17 = arith.constant 0 : index
    %17 = vector.load %arg8[%c0_16, %c0_17] : memref<1x768xf32, #tpu.memory_space<vmem>>, vector<1x768xf32>
    %18 = vector.broadcast %17 : vector<1x768xf32> to vector<2x768xf32>
    %19 = arith.addf %16, %18 : vector<2x768xf32>
    %20 = math.tanh %19 : vector<2x768xf32>
    %c0_18 = arith.constant 0 : index
    %c0_19 = arith.constant 0 : index
    %21 = vector.load %arg4[%c0_18, %c0_19] : memref<2x768xf32, #tpu.memory_space<vmem>>, vector<2x768xf32>
    %22 = arith.addf %20, %21 : vector<2x768xf32>
    %23 = arith.mulf %12, %22 : vector<2x768xf32>
    %24 = math.tanh %23 : vector<2x768xf32>
    %25 = arith.truncf %24 : vector<2x768xf32> to vector<2x768xbf16>
    %c0_20 = arith.constant 0 : index
    %c0_21 = arith.constant 0 : index
    %26 = vector.load %arg9[%c0_20, %c0_21] : memref<768x256xbf16, #tpu.memory_space<vmem>>, vector<768x256xbf16>
    %cst_22 = arith.constant dense<0.000000e+00> : vector<2x256xf32>
    %27 = tpu.matmul %25, %26, %cst_22 {dimension_numbers = #tpu.dot_dimension_numbers<[1], [0], [0], [1], [0, 0, 1, 1], [], []>} : vector<2x768xbf16>, vector<768x256xbf16>, vector<2x256xf32> -> vector<2x256xf32>
    %c0_23 = arith.constant 0 : index
    %c0_24 = arith.constant 0 : index
    %28 = vector.load %arg10[%c0_23, %c0_24] : memref<1x256xf32, #tpu.memory_space<vmem>>, vector<1x256xf32>
    %29 = vector.broadcast %28 : vector<1x256xf32> to vector<2x256xf32>
    %30 = arith.addf %27, %29 : vector<2x256xf32>
    %31 = math.tanh %30 : vector<2x256xf32>
    %32 = arith.truncf %31 : vector<2x256xf32> to vector<2x256xbf16>
    %c0_25 = arith.constant 0 : index
    %c0_26 = arith.constant 0 : index
    %33 = vector.load %arg11[%c0_25, %c0_26] : memref<256x128xbf16, #tpu.memory_space<vmem>>, vector<256x128xbf16>
    %cst_27 = arith.constant dense<0.000000e+00> : vector<2x128xf32>
    %34 = tpu.matmul %32, %33, %cst_27 {dimension_numbers = #tpu.dot_dimension_numbers<[1], [0], [0], [1], [0, 0, 1, 1], [], []>} : vector<2x256xbf16>, vector<256x128xbf16>, vector<2x128xf32> -> vector<2x128xf32>
    %c0_28 = arith.constant 0 : index
    %c0_29 = arith.constant 0 : index
    %35 = vector.load %arg12[%c0_28, %c0_29] : memref<1x128xf32, #tpu.memory_space<vmem>>, vector<1x128xf32>
    %36 = vector.broadcast %35 : vector<1x128xf32> to vector<2x128xf32>
    %37 = arith.addf %34, %36 : vector<2x128xf32>
    %c0_30 = arith.constant 0 : index
    %c0_31 = arith.constant 0 : index
    %38 = vector.load %arg14[%c0_30, %c0_31] : memref<2x128xf32, #tpu.memory_space<vmem>>, vector<2x128xf32>
    tpu.vector_store %arg14[%c0_30, %c0_31], %37 {strides = array<i32>} : memref<2x128xf32, #tpu.memory_space<vmem>>, vector<2x128xf32>,
    return
  }
}

</mosaic_0001>

<bundles_post_ra>
// kernel: cdmodel_forward.1
= control target key start
LH: loop header
LB: loop body
LE: loop exit
PB: predicated region body
PF: predicated region fallthrough
CT: control target
= control target key end

     0   :  { %20 = vsyncpa [#allocation3], 0  ;;  %s7235_s0 = inlined_call_operand.vmem [shape: f32[2,768], index: 0, kind: input, shape index: {}]   ;;  %s7236_s1 = inlined_call_operand.hbm [shape: f32[1,768], index: 1, kind: input, shape index: {}]   ;;  %s7237_s2 = inlined_call_operand.hbm [shape: f32[2,768], index: 2, kind: input, shape index: {}]   ;;  %s7238_s3 = inlined_call_operand.hbm [shape: f32[2,512], index: 3, kind: input, shape index: {}]   ;;  %s7239_s4 = inlined_call_operand.hbm [shape: f32[2,768], index: 4, kind: input, shape index: {}]   ;;  %s7240_s5 = inlined_call_operand.hbm [shape: bf16[768,768], index: 5, kind: input, shape index: {}]   ;;  %s7241_s6 = inlined_call_operand.hbm [shape: f32[1,768], index: 6, kind: input, shape index: {}]   ;;  %s7242_s7 = inlined_call_operand.hbm [shape: bf16[512,768], index: 7, kind: input, shape index: {}]   ;;  %s7243_s8 = inlined_call_operand.hbm [shape: f32[1,768], index: 8, kind: input, shape index: {}]   ;;  %s7244_s9 = inlined_call_operand.hbm [shape: bf16[768,256], index: 9, kind: input, shape index: {}]   ;;  %s7245_s10 = inlined_call_operand.hbm [shape: f32[1,256], index: 10, kind: input, shape index: {}]   ;;  %s7246_s11 = inlined_call_operand.hbm [shape: bf16[256,128], index: 11, kind: input, shape index: {}]   ;;  %s7247_s12 = inlined_call_operand.hbm [shape: f32[1,128], index: 12, kind: input, shape index: {}]   ;;  %s7248_s13 = inlined_call_operand.vmem [shape: f32[2,768], index: 13, kind: output, shape index: {0}]   ;;  %s7249_s14 = inlined_call_operand.hbm [shape: f32[2,128], index: 14, kind: output, shape index: {1}]  }
   0x1   :  { %21 = vsyncpa [#allocation6], 0 }
   0x2   :  { %22 = vsyncpa [#allocation9], 0 }
   0x3   :  { %23 = vsyncpa [#allocation12], 0 }
   0x4   :  { %24 = vsyncpa [#allocation15], 0 }
   0x5   :  { %25 = vsyncpa [#allocation18], 0 }
   0x6   :  { %26 = vsyncpa [#allocation21], 0 }
   0x7   :  { %27 = vsyncpa [#allocation4], 0  ;;  %s6786_s29 = smov [#allocation5]   ;;  %s6787_s15 = smov [#allocation8]  }
   0x8   :  { %s46_s30 = sshll.u32 %s6786_s29, 4  ;;  %s66_s16 = sshll.u32 %s6787_s15, 4  ;;  %s47_s30 = int_to_ptr.vmem [resolvable:$true] %s46_s30  ;;  %s67_s16 = int_to_ptr.vmem [resolvable:$true] %s66_s16 }
   0x9   :  { %s6484_s19 = scalar_lea.hbm %s7237_s2, 192 }
   0xa   :  { %p6485_p0 = scmp.ne.s32.totalorder %s7237_s2, %s6484_s19  ;;  %p6488_p1 = scmp.lt.u32.totalorder %s6484_s19, %s7237_s2 }
   0xc   :  { %p6490_p2 = pnand %p6488_p1, %p6485_p0 }
   0xe   :  { %6493 = shalt.err (!%p6490_p2)
}
   0xf   :  { %s6494_s24 = scalar_lea.vmem %s47_s30, 192  ;;  %p6499_p4 = scmp.lt.s32.totalorder %s47_s30, %s47_s30 }
  0x10   :  { %p6495_p3 = scmp.ne.s32.totalorder %s47_s30, %s6494_s24  ;;  %p6500_p5 = scmp.lt.s32.totalorder %s6494_s24, %s6494_s24 }
  0x12   :  { %p6501_p6 = por %p6500_p5, %p6499_p4 }
  0x14   :  { %p6502_p7 = pnand %p6501_p6, %p6495_p3 }
  0x16   :  { %6505 = shalt.err (!%p6502_p7)
}
  0x17   :  { %49 = dma.hbm_to_vmem [thread:$0]  %s7237_s2, 192, %s47_s30, [#allocation6]  }
  0x18   :  { %s6506_s29 = scalar_lea.hbm %s7239_s4, 192 }
  0x19   :  { %p6507_p8 = scmp.ne.s32.totalorder %s7239_s4, %s6506_s29  ;;  %p6510_p9 = scmp.lt.u32.totalorder %s6506_s29, %s7239_s4 }
  0x1b   :  { %p6512_p10 = pnand %p6510_p9, %p6507_p8 }
  0x1d   :  { %6515 = shalt.err (!%p6512_p10)
}
  0x1e   :  { %s6516_s20 = scalar_lea.vmem %s67_s16, 192  ;;  %p6521_p12 = scmp.lt.s32.totalorder %s67_s16, %s67_s16 }
  0x1f   :  { %p6517_p11 = scmp.ne.s32.totalorder %s67_s16, %s6516_s20  ;;  %p6522_p13 = scmp.lt.s32.totalorder %s6516_s20, %s6516_s20 }
  0x21   :  { %p6523_p0 = por %p6522_p13, %p6521_p12 }
  0x23   :  { %p6524_p1 = pnand %p6523_p0, %p6517_p11 }
  0x25   :  { %6527 = shalt.err (!%p6524_p1)
}
  0x26   :  { %69 = dma.hbm_to_vmem [thread:$0]  %s7239_s4, 192, %s67_s16, [#allocation9]  }
  0x27   :  { %s6788_s21 = smov [#allocation11]   ;;  %s6789_s23 = smov [#allocation14]  }
  0x28   :  { %s88_s22 = sshll.u32 %s6788_s21, 4  ;;  %s110_s24 = sshll.u32 %s6789_s23, 4  ;;  %s89_s22 = int_to_ptr.vmem [resolvable:$true] %s88_s22  ;;  %s111_s24 = int_to_ptr.vmem [resolvable:$true] %s110_s24 }
  0x29   :  { %s6528_s27 = scalar_lea.hbm %s7241_s6, 96 }
  0x2a   :  { %p6529_p2 = scmp.ne.s32.totalorder %s7241_s6, %s6528_s27  ;;  %p6532_p3 = scmp.lt.u32.totalorder %s6528_s27, %s7241_s6 }
  0x2c   :  { %p6534_p4 = pnand %p6532_p3, %p6529_p2 }
  0x2e   :  { %6537 = shalt.err (!%p6534_p4)
}
  0x2f   :  { %s6538_s4 = scalar_lea.vmem %s89_s22, 96  ;;  %p6543_p6 = scmp.lt.s32.totalorder %s89_s22, %s89_s22 }
  0x30   :  { %p6539_p5 = scmp.ne.s32.totalorder %s89_s22, %s6538_s4  ;;  %p6544_p7 = scmp.lt.s32.totalorder %s6538_s4, %s6538_s4 }
  0x32   :  { %p6545_p8 = por %p6544_p7, %p6543_p6 }
  0x34   :  { %p6546_p9 = pnand %p6545_p8, %p6539_p5 }
  0x36   :  { %6549 = shalt.err (!%p6546_p9)
}
  0x37   :  { %91 = dma.hbm_to_vmem [thread:$0]  %s7241_s6, 96, %s89_s22, [#allocation12]  }
  0x38   :  { %s6550_s2 = scalar_lea.hbm %s7243_s8, 96 }
  0x39   :  { %p6551_p10 = scmp.ne.s32.totalorder %s7243_s8, %s6550_s2  ;;  %p6554_p11 = scmp.lt.u32.totalorder %s6550_s2, %s7243_s8 }
  0x3b   :  { %p6556_p12 = pnand %p6554_p11, %p6551_p10 }
  0x3d   :  { %6559 = shalt.err (!%p6556_p12)
}
  0x3e   :  { %s6560_s26 = scalar_lea.vmem %s111_s24, 96  ;;  %p6565_p0 = scmp.lt.s32.totalorder %s111_s24, %s111_s24 }
  0x3f   :  { %p6561_p13 = scmp.ne.s32.totalorder %s111_s24, %s6560_s26  ;;  %p6566_p1 = scmp.lt.s32.totalorder %s6560_s26, %s6560_s26 }
  0x41   :  { %p6567_p2 = por %p6566_p1, %p6565_p0 }
  0x43   :  { %p6568_p3 = pnand %p6567_p2, %p6561_p13 }
  0x45   :  { %6571 = shalt.err (!%p6568_p3)
}
  0x46   :  { %113 = dma.hbm_to_vmem [thread:$0]  %s7243_s8, 96, %s111_s24, [#allocation15]  }
  0x47   :  { %s6790_s27 = smov [#allocation17]   ;;  %s6791_s29 = smov [#allocation2]  }
  0x48   :  { %s132_s28 = sshll.u32 %s6790_s27, 4  ;;  %s36_s15 = sshll.u32 %s6791_s29, 4  ;;  %s133_s28 = int_to_ptr.vmem [resolvable:$true] %s132_s28  ;;  %s37_s15 = int_to_ptr.vmem [resolvable:$true] %s36_s15 }
  0x49   :  { %s6572_s16 = scalar_lea.hbm %s7245_s10, 32 }
  0x4a   :  { %p6573_p4 = scmp.ne.s32.totalorder %s7245_s10, %s6572_s16  ;;  %p6576_p5 = scmp.lt.u32.totalorder %s6572_s16, %s7245_s10 }
  0x4c   :  { %p6578_p6 = pnand %p6576_p5, %p6573_p4 }
  0x4e   :  { %6581 = shalt.err (!%p6578_p6)
}
  0x4f   :  { %s6582_s8 = scalar_lea.vmem %s133_s28, 32  ;;  %p6587_p8 = scmp.lt.s32.totalorder %s133_s28, %s133_s28 }
  0x50   :  { %p6583_p7 = scmp.ne.s32.totalorder %s133_s28, %s6582_s8  ;;  %p6588_p9 = scmp.lt.s32.totalorder %s6582_s8, %s6582_s8 }
  0x52   :  { %p6589_p10 = por %p6588_p9, %p6587_p8 }
  0x54   :  { %p6590_p11 = pnand %p6589_p10, %p6583_p7 }
  0x56   :  { %6593 = shalt.err (!%p6590_p11)
}
  0x57   :  { %135 = dma.hbm_to_vmem [thread:$0]  %s7245_s10, 32, %s133_s28, [#allocation18]  }
  0x58   :  { %s6594_s25 = scalar_lea.hbm %s7236_s1, 96 }
  0x59   :  { %p6595_p12 = scmp.ne.s32.totalorder %s7236_s1, %s6594_s25  ;;  %p6598_p13 = scmp.lt.u32.totalorder %s6594_s25, %s7236_s1 }
  0x5b   :  { %p6600_p0 = pnand %p6598_p13, %p6595_p12 }
  0x5d   :  { %6603 = shalt.err (!%p6600_p0)
}
  0x5e   :  { %s6604_s29 = scalar_lea.vmem %s37_s15, 96  ;;  %p6609_p2 = scmp.lt.s32.totalorder %s37_s15, %s37_s15 }
  0x5f   :  { %p6605_p1 = scmp.ne.s32.totalorder %s37_s15, %s6604_s29  ;;  %p6610_p3 = scmp.lt.s32.totalorder %s6604_s29, %s6604_s29 }
  0x61   :  { %p6611_p4 = por %p6610_p3, %p6609_p2 }
  0x63   :  { %p6612_p5 = pnand %p6611_p4, %p6605_p1 }
  0x65   :  { %6615 = shalt.err (!%p6612_p5)
}
  0x66   :  { %39 = dma.hbm_to_vmem [thread:$0]  %s7236_s1, 96, %s37_s15, [#allocation3]  }
  0x67   :  { %s6792_s17 = smov [#allocation7]   ;;  %s6793_s16 = smov [#allocation10]  }
  0x68   :  { %s56_s4 = sshll.u32 %s6792_s17, 4  ;;  %s75_s18 = sshll.u32 %s6793_s16, 4  ;;  %s57_s4 = int_to_ptr.vmem [resolvable:$true] %s56_s4  ;;  %s6953_s18 = int_to_ptr.vmem [resolvable:$true] %s75_s18 }
  0x69   :  { %s6616_s2 = scalar_lea.hbm %s7238_s3, 128 }
  0x6a   :  { %p6617_p6 = scmp.ne.s32.totalorder %s7238_s3, %s6616_s2  ;;  %p6620_p7 = scmp.lt.u32.totalorder %s6616_s2, %s7238_s3 }
  0x6c   :  { %p6622_p8 = pnand %p6620_p7, %p6617_p6 }
  0x6e   :  { %6625 = shalt.err (!%p6622_p8)
}
  0x6f   :  { %s6626_s1 = scalar_lea.vmem %s57_s4, 128  ;;  %p6631_p10 = scmp.lt.s32.totalorder %s57_s4, %s57_s4 }
  0x70   :  { %p6627_p9 = scmp.ne.s32.totalorder %s57_s4, %s6626_s1  ;;  %p6632_p11 = scmp.lt.s32.totalorder %s6626_s1, %s6626_s1 }
  0x72   :  { %p6633_p12 = por %p6632_p11, %p6631_p10 }
  0x74   :  { %p6634_p13 = pnand %p6633_p12, %p6627_p9 }
  0x76   :  { %6637 = shalt.err (!%p6634_p13)
}
  0x77   :  { %59 = dma.hbm_to_vmem [thread:$0]  %s7238_s3, 128, %s57_s4, [#allocation6]  }
  0x78   :  { %s6638_s6 = scalar_lea.hbm %s7240_s5, 36864 }
  0x79   :  { %p6639_p0 = scmp.ne.s32.totalorder %s7240_s5, %s6638_s6  ;;  %p6642_p1 = scmp.lt.u32.totalorder %s6638_s6, %s7240_s5 }
  0x7b   :  { %p6644_p2 = pnand %p6642_p1, %p6639_p0 }
  0x7d   :  { %6647 = shalt.err (!%p6644_p2)
}
  0x7e   :  { %s6648_s28 = scalar_lea.vmem %s6953_s18, 36864  ;;  %p6653_p4 = scmp.lt.s32.totalorder %s6953_s18, %s6953_s18 }
  0x7f   :  { %p6649_p3 = scmp.ne.s32.totalorder %s6953_s18, %s6648_s28  ;;  %p6654_p5 = scmp.lt.s32.totalorder %s6648_s28, %s6648_s28 }
  0x81   :  { %p6655_p6 = por %p6654_p5, %p6653_p4 }
  0x83   :  { %p6656_p7 = pnand %p6655_p6, %p6649_p3 }
  0x85   :  { %6659 = shalt.err (!%p6656_p7)
}
  0x86   :  { %s6794_s3 = smov 384   ;;  %s6795_s17 = smov 24  }
  0x87   :  { %81 = dma.hbm_to_vmem [thread:$0]  %s7240_s5, 36864, %s6953_s18, [#allocation9], %s6794_s3, %s6794_s3, %s6795_s17  }
  0x88   :  { %s6796_s19 = smov [#allocation13]   ;;  %s6797_s2 = smov [#allocation16]  }
  0x89   :  { %s97_s20 = sshll.u32 %s6796_s19, 4  ;;  %s119_s8 = sshll.u32 %s6797_s2, 4  ;;  %s98_s20 = int_to_ptr.vmem [resolvable:$true] %s97_s20  ;;  %s6984_s8 = int_to_ptr.vmem [resolvable:$true] %s119_s8 }
  0x8a   :  { %s6660_s21 = scalar_lea.hbm %s7242_s7, 24576 }
  0x8b   :  { %p6661_p8 = scmp.ne.s32.totalorder %s7242_s7, %s6660_s21  ;;  %p6664_p9 = scmp.lt.u32.totalorder %s6660_s21, %s7242_s7 }
  0x8d   :  { %p6666_p10 = pnand %p6664_p9, %p6661_p8 }
  0x8f   :  { %6669 = shalt.err (!%p6666_p10)
}
  0x90   :  { %s6670_s5 = scalar_lea.vmem %s98_s20, 24576  ;;  %p6675_p12 = scmp.lt.s32.totalorder %s98_s20, %s98_s20 }
  0x91   :  { %p6671_p11 = scmp.ne.s32.totalorder %s98_s20, %s6670_s5  ;;  %p6676_p13 = scmp.lt.s32.totalorder %s6670_s5, %s6670_s5 }
  0x93   :  { %p6677_p0 = por %p6676_p13, %p6675_p12 }
  0x95   :  { %p6678_p1 = pnand %p6677_p0, %p6671_p11 }
  0x97   :  { %6681 = shalt.err (!%p6678_p1)
}
  0x98   :  { %103 = dma.hbm_to_vmem [thread:$0]  %s7242_s7, 24576, %s98_s20, [#allocation12], %s6794_s3, %s6794_s3, %s6795_s17  }
  0x99   :  { %s6682_s27 = scalar_lea.hbm %s7244_s9, 12288 }
  0x9a   :  { %p6683_p2 = scmp.ne.s32.totalorder %s7244_s9, %s6682_s27  ;;  %p6686_p3 = scmp.lt.u32.totalorder %s6682_s27, %s7244_s9 }
  0x9c   :  { %p6688_p4 = pnand %p6686_p3, %p6683_p2 }
  0x9e   :  { %6691 = shalt.err (!%p6688_p4)
}
  0x9f   :  { %s6692_s16 = scalar_lea.vmem %s6984_s8, 12288  ;;  %p6697_p6 = scmp.lt.s32.totalorder %s6984_s8, %s6984_s8 }
  0xa0   :  { %p6693_p5 = scmp.ne.s32.totalorder %s6984_s8, %s6692_s16  ;;  %p6698_p7 = scmp.lt.s32.totalorder %s6692_s16, %s6692_s16 }
  0xa2   :  { %p6699_p8 = por %p6698_p7, %p6697_p6 }
  0xa4   :  { %p6700_p9 = pnand %p6699_p8, %p6693_p5 }
  0xa6   :  { %6703 = shalt.err (!%p6700_p9)
}
  0xa7   :  { %s6798_s7 = smov 128   ;;  %s6799_s3 = smov 8  }
  0xa8   :  { %125 = dma.hbm_to_vmem [thread:$0]  %s7244_s9, 12288, %s6984_s8, [#allocation15], %s6798_s7, %s6798_s7, %s6799_s3  }
  0xa9   :  { %s6800_s20 = smov [#allocation19]   ;;  %s6704_s21 = scalar_lea.hbm %s7246_s11, 2048 }
  0xaa   :  { %s141_s2 = sshll.u32 %s6800_s20, 4  ;;  %p6705_p10 = scmp.ne.s32.totalorder %s7246_s11, %s6704_s21  ;;  %s142_s2 = int_to_ptr.vmem [resolvable:$true] %s141_s2 }
  0xab   :  { %p6708_p11 = scmp.lt.u32.totalorder %s6704_s21, %s7246_s11 }
  0xad   :  { %p6710_p12 = pnand %p6708_p11, %p6705_p10 }
  0xaf   :  { %6713 = shalt.err (!%p6710_p12)
}
  0xb0   :  { %s6714_s5 = scalar_lea.vmem %s142_s2, 2048  ;;  %p6719_p0 = scmp.lt.s32.totalorder %s142_s2, %s142_s2 }
  0xb1   :  { %p6715_p13 = scmp.ne.s32.totalorder %s142_s2, %s6714_s5  ;;  %p6720_p1 = scmp.lt.s32.totalorder %s6714_s5, %s6714_s5 }
  0xb3   :  { %p6721_p2 = por %p6720_p1, %p6719_p0 }
  0xb5   :  { %p6722_p3 = pnand %p6721_p2, %p6715_p13 }
  0xb7   :  { %6725 = shalt.err (!%p6722_p3)
}
  0xb8   :  { %s6801_s9 = smov 64   ;;  %s6802_s8 = smov 4  }
  0xb9   :  { %147 = dma.hbm_to_vmem [thread:$0]  %s7246_s11, 2048, %s142_s2, [#allocation18], %s6801_s9, %s6801_s9, %s6802_s8  }
  0xba   :  { %s6803_s6 = smov [#allocation20]   ;;  %s6726_s10 = scalar_lea.hbm %s7247_s12, 16 }
  0xbb   :  { %s154_s22 = sshll.u32 %s6803_s6, 4  ;;  %p6727_p4 = scmp.ne.s32.totalorder %s7247_s12, %s6726_s10  ;;  %s155_s22 = int_to_ptr.vmem [resolvable:$true] %s154_s22 }
  0xbc   :  { %p6730_p5 = scmp.lt.u32.totalorder %s6726_s10, %s7247_s12 }
  0xbe   :  { %p6732_p6 = pnand %p6730_p5, %p6727_p4 }
  0xc0   :  { %6735 = shalt.err (!%p6732_p6)
}
  0xc1   :  { %s6736_s3 = scalar_lea.vmem %s155_s22, 16  ;;  %s6740_s11 = scalar_lea.vmem %s155_s22, 32 }
  0xc2   :  { %p6737_p7 = scmp.ne.s32.totalorder %s155_s22, %s6736_s3  ;;  %p6741_p8 = scmp.lt.s32.totalorder %s155_s22, %s155_s22 }
  0xc3   :  { %p6742_p9 = scmp.lt.s32.totalorder %s6740_s11, %s6736_s3 }
  0xc5   :  { %p6743_p10 = por %p6742_p9, %p6741_p8 }
  0xc7   :  { %p6744_p11 = pnand %p6743_p10, %p6737_p7 }
  0xc9   :  { %6747 = shalt.err (!%p6744_p11)
}
  0xca   :  { %157 = dma.hbm_to_vmem [thread:$0]  %s7247_s12, 16, %s155_s22, [#allocation21]  }
  0xcb   :  { %6770 = dma.done.wait [#allocation3], 96  }
  0xcc   :  { %6771 = vsyncadd [#allocation3], 4294967200 }
  0xcd   :  { %6772 = dma.done.wait [#allocation6], 320  }
  0xce   :  { %6773 = vsyncadd [#allocation6], 4294966976 }
  0xcf   :  { %6774 = dma.done.wait [#allocation9], 37056  }
  0xd0   :  { %6775 = vsyncadd [#allocation9], 4294930240 }
  0xd1   :  { %6776 = dma.done.wait [#allocation12], 24672  }
  0xd2   :  { %6777 = vsyncadd [#allocation12], 4294942624 }
  0xd3   :  { %6778 = dma.done.wait [#allocation15], 12384  }
  0xd4   :  { %6779 = vsyncadd [#allocation15], 4294954912 }
  0xd5   :  { %6780 = dma.done.wait [#allocation18], 2080  }
  0xd6   :  { %6781 = vsyncadd [#allocation18], 4294965216 }
  0xd7   :  { %6782 = dma.done.wait [#allocation21], 16  }
  0xd8   :  { %6783 = vsyncadd [#allocation21], 4294967280  ;;  %v5561_v0 = vld [vmem:[#allocation10 + $0x4] ss:$24 sps:$4 sm:$0xff]   ;;  %v5565_v2 = vld [vmem:[#allocation10] ss:$24 sps:$4 sm:$0xff]   ;;  %v199_v36 = vlaneseq }
  0xd9   :  { %v5563_v1 = vld [vmem:[#allocation10 + $0x30c] ss:$24 sps:$4 sm:$0xff]   ;;  %2055 = vmatprep.subr.bf16.mxu0 %v5561_v0  ;;  %v5566_v3 = vld [vmem:[#allocation10 + $0x308] ss:$24 sps:$4 sm:$0xff]   ;;  %v5569_v5 = vld [vmem:[#allocation10 + $0x33c] ss:$24 sps:$4 sm:$0xff]  }
  0xda   :  { %2219 = vmatprep.subr.bf16.mxu1 %v5563_v1  ;;  %v5567_v4 = vld [vmem:[#allocation10 + $0x34] ss:$24 sps:$4 sm:$0xff]   ;;  %2056 = vmatpush1.bf16.msra.mxu0 %v5565_v2  ;;  %v5571_v6 = vld [vmem:[#allocation10 + $0x30] ss:$24 sps:$4 sm:$0xff]   ;;  %v5573_v8 = vld [vmem:[#allocation10 + $0x64] ss:$24 sps:$4 sm:$0xff]  }
  0xdb   :  { %2220 = vmatpush1.bf16.msra.mxu1 %v5566_v3  ;;  %2057 = vmatprep.subr.bf16.mxu0 %v5567_v4  ;;  %v5572_v7 = vld [vmem:[#allocation10 + $0x338] ss:$24 sps:$4 sm:$0xff]   ;;  %v5575_v9 = vld [vmem:[#allocation10 + $0x36c] ss:$24 sps:$4 sm:$0xff]   ;;  %v5578_v11 = vld [vmem:[#allocation10 + $0x368] ss:$24 sps:$4 sm:$0xff]  }
  0xdc   :  { %2221 = vmatprep.subr.bf16.mxu1 %v5569_v5  ;;  %v5577_v10 = vld [vmem:[#allocation10 + $0x60] ss:$24 sps:$4 sm:$0xff]   ;;  %v5579_v12 = vld [vmem:[#allocation10 + $0x94] ss:$24 sps:$4 sm:$0xff]   ;;  %v5583_v14 = vld [vmem:[#allocation10 + $0x90] ss:$24 sps:$4 sm:$0xff]  }
  0xdd   :  { %v5581_v13 = vld [vmem:[#allocation10 + $0x39c] ss:$24 sps:$4 sm:$0xff]   ;;  %v5584_v15 = vld [vmem:[#allocation10 + $0x398] ss:$24 sps:$4 sm:$0xff]   ;;  %v5587_v17 = vld [vmem:[#allocation10 + $0x3cc] ss:$24 sps:$4 sm:$0xff]  }
  0xde   :  { %2058 = vmatpush1.bf16.msra.mxu0 %v5571_v6  ;;  %v5585_v16 = vld [vmem:[#allocation10 + $0xc4] ss:$24 sps:$4 sm:$0xff]   ;;  %v5589_v18 = vld [vmem:[#allocation10 + $0xc0] ss:$24 sps:$4 sm:$0xff]   ;;  %v5591_v20 = vld [vmem:[#allocation10 + $0xf4] ss:$24 sps:$4 sm:$0xff]  }
  0xdf   :  { %2222 = vmatpush1.bf16.msra.mxu1 %v5572_v7  ;;  %2059 = vmatprep.subr.bf16.mxu0 %v5573_v8  ;;  %v5590_v19 = vld [vmem:[#allocation10 + $0x3c8] ss:$24 sps:$4 sm:$0xff]   ;;  %v5593_v21 = vld [vmem:[#allocation10 + $0x3fc] ss:$24 sps:$4 sm:$0xff]   ;;  %v5596_v23 = vld [vmem:[#allocation10 + $0x3f8] ss:$24 sps:$4 sm:$0xff]  }
  0xe0   :  { %2223 = vmatprep.subr.bf16.mxu1 %v5575_v9  ;;  %v5595_v22 = vld [vmem:[#allocation10 + $0xf0] ss:$24 sps:$4 sm:$0xff]   ;;  %v5597_v24 = vld [vmem:[#allocation10 + $0x124] ss:$24 sps:$4 sm:$0xff]   ;;  %v5601_v26 = vld [vmem:[#allocation10 + $0x120] ss:$24 sps:$4 sm:$0xff]  }
  0xe1   :  { %v5599_v25 = vld [vmem:[#allocation10 + $0x42c] ss:$24 sps:$4 sm:$0xff]   ;;  %v5602_v27 = vld [vmem:[#allocation10 + $0x428] ss:$24 sps:$4 sm:$0xff]   ;;  %v5605_v29 = vld [vmem:[#allocation10 + $0x45c] ss:$24 sps:$4 sm:$0xff]  }
  0xe2   :  { %2060 = vmatpush1.bf16.msra.mxu0 %v5577_v10  ;;  %v5603_v28 = vld [vmem:[#allocation10 + $0x154] ss:$24 sps:$4 sm:$0xff]   ;;  %v5607_v30 = vld [vmem:[#allocation10 + $0x150] ss:$24 sps:$4 sm:$0xff]   ;;  %v5609_v32 = vld [vmem:[#allocation10 + $0x184] ss:$24 sps:$4 sm:$0xff]  }
  0xe3   :  { %2224 = vmatpush1.bf16.msra.mxu1 %v5578_v11  ;;  %2061 = vmatprep.subr.bf16.mxu0 %v5579_v12  ;;  %v5608_v31 = vld [vmem:[#allocation10 + $0x458] ss:$24 sps:$4 sm:$0xff]   ;;  %v5611_v33 = vld [vmem:[#allocation10 + $0x48c] ss:$24 sps:$4 sm:$0xff]   ;;  %v5614_v35 = vld [vmem:[#allocation10 + $0x488] ss:$24 sps:$4 sm:$0xff]  }
  0xe4   :  { %2225 = vmatprep.subr.bf16.mxu1 %v5581_v13  ;;  %v5613_v34 = vld [vmem:[#allocation10 + $0x180] ss:$24 sps:$4 sm:$0xff]   ;;  %v6804_v37 = vmov 1983009808   ;;  %v5615_v39 = vld [vmem:[#allocation10 + $0x1b4] ss:$24 sps:$4 sm:$0xff]  }
  0xe5   :  { %v226_v38 = vunpack.c.l.s4 %v6804_v37  ;;  %v5617_v40 = vld [vmem:[#allocation10 + $0x4bc] ss:$24 sps:$4 sm:$0xff]   ;;  %v5619_v41 = vld [vmem:[#allocation10 + $0x1b0] ss:$24 sps:$4 sm:$0xff]   ;;  %v7039_v42 = vshrl.u32 %v199_v36, 7  ;;  %v254_v52 = vld [vmem:[#allocation5] sm:$0xff] }
  0xe6   :  { %2062 = vmatpush1.bf16.msra.mxu0 %v5583_v14  ;;  %v5620_v44 = vld [vmem:[#allocation10 + $0x4b8] ss:$24 sps:$4 sm:$0xff]   ;;  %v5621_v45 = vld [vmem:[#allocation10 + $0x1e4] ss:$24 sps:$4 sm:$0xff]   ;;  %v5626_v48 = vld [vmem:[#allocation10 + $0x4e8] ss:$24 sps:$4 sm:$0xff]   ;;  %v258_v55 = vcombine.high %v254_v52, %v254_v52 }
  0xe7   :  { %2226 = vmatpush1.bf16.msra.mxu1 %v5584_v15  ;;  %2063 = vmatprep.subr.bf16.mxu0 %v5585_v16  ;;  %v227_v43 = vunpack.c.0.s8 %v226_v38  ;;  %v5623_v46 = vld [vmem:[#allocation10 + $0x4ec] ss:$24 sps:$4 sm:$0xff]   ;;  %v5625_v47 = vld [vmem:[#allocation10 + $0x1e0] ss:$24 sps:$4 sm:$0xff]   ;;  %v5629_v51 = vld [vmem:[#allocation10 + $0x51c] ss:$24 sps:$4 sm:$0xff]  }
  0xe8   :  { %2227 = vmatprep.subr.bf16.mxu1 %v5587_v17  ;;  %v5627_v50 = vld [vmem:[#allocation10 + $0x214] ss:$24 sps:$4 sm:$0xff]   ;;  %v5631_v53 = vld [vmem:[#allocation10 + $0x210] ss:$24 sps:$4 sm:$0xff]   ;;  %v5633_v57 = vld [vmem:[#allocation10 + $0x244] ss:$24 sps:$4 sm:$0xff]  }
  0xe9   :  { %v7042_v49 = vsub.s32 %v227_v43, %v7039_v42  ;;  %v5632_v56 = vld [vmem:[#allocation10 + $0x518] ss:$24 sps:$4 sm:$0xff]   ;;  %v5635_v58 = vld [vmem:[#allocation10 + $0x54c] ss:$24 sps:$4 sm:$0xff]   ;;  %v5638_v0 = vld [vmem:[#allocation10 + $0x548] ss:$24 sps:$4 sm:$0xff]  }
  0xea   :  { %2064 = vmatpush1.bf16.msra.mxu0 %v5589_v18  ;;  %v5637_v61 = vld [vmem:[#allocation10 + $0x240] ss:$24 sps:$4 sm:$0xff]   ;;  %v5639_v1 = vld [vmem:[#allocation10 + $0x274] ss:$24 sps:$4 sm:$0xff]   ;;  %v5643_v4 = vld [vmem:[#allocation10 + $0x270] ss:$24 sps:$4 sm:$0xff]  }
  0xeb   :  { %2228 = vmatpush1.bf16.msra.mxu1 %v5590_v19  ;;  %2065 = vmatprep.subr.bf16.mxu0 %v5591_v20  ;;  %v265_v54 = vrot.slane %v254_v52, %v7042_v49  ;;  %v272_v60 = vrot.slane %v258_v55, %v7042_v49  ;;  %v5641_v2 = vld [vmem:[#allocation10 + $0x57c] ss:$24 sps:$4 sm:$0xff]   ;;  %v5644_v5 = vld [vmem:[#allocation10 + $0x578] ss:$24 sps:$4 sm:$0xff]   ;;  %v5647_v7 = vld [vmem:[#allocation10 + $0x5ac] ss:$24 sps:$4 sm:$0xff]  }
  0xec   :  { %2229 = vmatprep.subr.bf16.mxu1 %v5593_v21  ;;  %v5645_v6 = vld [vmem:[#allocation10 + $0x2a4] ss:$24 sps:$4 sm:$0xff]   ;;  %v5649_v8 = vld [vmem:[#allocation10 + $0x2a0] ss:$24 sps:$4 sm:$0xff]   ;;  %v5651_v10 = vld [vmem:[#allocation10 + $0x2d4] ss:$24 sps:$4 sm:$0xff]  }
  0xed   :  { %v273_v59 = vcombine.high %v265_v54, %v265_v54  ;;  %v274_v63 = vcombine.high %v272_v60, %v272_v60  ;;  %v5650_v9 = vld [vmem:[#allocation10 + $0x5a8] ss:$24 sps:$4 sm:$0xff]   ;;  %v5653_v11 = vld [vmem:[#allocation10 + $0x5dc] ss:$24 sps:$4 sm:$0xff]   ;;  %v5656_v13 = vld [vmem:[#allocation10 + $0x5d8] ss:$24 sps:$4 sm:$0xff]   ;;  %v7052_v17 = vpack.c.bf16 %v265_v54, %v265_v54  ;;  %v7054_v18 = vpack.c.bf16 %v272_v60, %v272_v60 }
  0xee   :  { %2066 = vmatpush1.bf16.msra.mxu0 %v5595_v22  ;;  %v5655_v12 = vld [vmem:[#allocation10 + $0x2d0] ss:$24 sps:$4 sm:$0xff]   ;;  %v5659_v14 = vld [vmem:[#allocation10 + $0x304] ss:$24 sps:$4 sm:$0xff]   ;;  %v5657_v16 = vld [vmem:[#allocation10 + $0x300] ss:$24 sps:$4 sm:$0xff]  }
  0xef   :  { %2230 = vmatpush1.bf16.msra.mxu1 %v5596_v23  ;;  %2067 = vmatprep.subr.bf16.mxu0 %v5597_v24  ;;  %v7046_v62 = vpack.c.bf16 %v273_v59, %v273_v59  ;;  %v7048_v3 = vpack.c.bf16 %v274_v63, %v274_v63  ;;  %v5663_v15 = vld [vmem:[#allocation10 + $0x60c] ss:$24 sps:$4 sm:$0xff]   ;;  %v5661_v19 = vld [vmem:[#allocation10 + $0x608] ss:$24 sps:$4 sm:$0xff]   ;;  %v5669_v21 = vld [vmem:[#allocation10 + $0x63c] ss:$24 sps:$4 sm:$0xff]  }
  0xf0   :  { %2231 = vmatprep.subr.bf16.mxu1 %v5599_v25  ;;  %v5666_v20 = vld [vmem:[#allocation10 + $0x334] ss:$24 sps:$4 sm:$0xff]   ;;  %v5664_v22 = vld [vmem:[#allocation10 + $0x330] ss:$24 sps:$4 sm:$0xff]   ;;  %v5672_v24 = vld [vmem:[#allocation10 + $0x364] ss:$24 sps:$4 sm:$0xff]  }
  0xf1   :  { %2087 = vmatprep.mubr.bf16.mxu0 %v7046_v62  ;;  %2251 = vmatprep.mubr.bf16.mxu1 %v7048_v3  ;;  %v5667_v23 = vld [vmem:[#allocation10 + $0x638] ss:$24 sps:$4 sm:$0xff]   ;;  %v5675_v25 = vld [vmem:[#allocation10 + $0x66c] ss:$24 sps:$4 sm:$0xff]   ;;  %v5693_v37 = vld [vmem:[#allocation10 + $0x6fc] ss:$24 sps:$4 sm:$0xff]  }
  0xf2   :  { %2068 = vmatpush1.bf16.msra.mxu0 %v5601_v26  ;;  %v5670_v26 = vld [vmem:[#allocation10 + $0x360] ss:$24 sps:$4 sm:$0xff]   ;;  %v5690_v36 = vld [vmem:[#allocation10 + $0x3f4] ss:$24 sps:$4 sm:$0xff]   ;;  %v5688_v38 = vld [vmem:[#allocation10 + $0x3f0] ss:$24 sps:$4 sm:$0xff]  }
  0xf3   :  { %2232 = vmatpush1.bf16.msra.mxu1 %v5602_v27  ;;  %2069 = vmatprep.subr.bf16.mxu0 %v5603_v28  ;;  %v5673_v27 = vld [vmem:[#allocation10 + $0x668] ss:$24 sps:$4 sm:$0xff]   ;;  %v5678_v28 = vld [vmem:[#allocation10 + $0x394] ss:$24 sps:$4 sm:$0xff]   ;;  %v5703_v52 = vld [vmem:[#allocation10 + $0x758] ss:$24 sps:$4 sm:$0xff]  }
  0xf4   :  { %2233 = vmatprep.subr.bf16.mxu1 %v5605_v29  ;;  %v5681_v29 = vld [vmem:[#allocation10 + $0x69c] ss:$24 sps:$4 sm:$0xff]   ;;  %v7059_v43 = vld.sshfl [vmem:[#allocation5 + $0x8] sm:$0x33 pattern:$0x76325410] }
  0xf5   :  { %v5711_v54 = vld [vmem:[#allocation10 + $0x78c] ss:$24 sps:$4 sm:$0xff]   ;;  %v5706_v55 = vld [vmem:[#allocation10 + $0x480] ss:$24 sps:$4 sm:$0xff]   ;;  %v5712_v59 = vld [vmem:[#allocation10 + $0x4b0] ss:$24 sps:$4 sm:$0xff]  }
  0xf6   :  { %2070 = vmatpush1.bf16.msra.mxu0 %v5607_v30  ;;  %v5676_v30 = vld [vmem:[#allocation10 + $0x390] ss:$24 sps:$4 sm:$0xff]   ;;  %v5723_v63 = vld [vmem:[#allocation10 + $0x7ec] ss:$24 sps:$4 sm:$0xff]  }
  0xf7   :  { %2234 = vmatpush1.bf16.msra.mxu1 %v5608_v31  ;;  %2071 = vmatprep.subr.bf16.mxu0 %v5609_v32  ;;  %v5679_v31 = vld [vmem:[#allocation10 + $0x698] ss:$24 sps:$4 sm:$0xff]   ;;  %v5684_v32 = vld [vmem:[#allocation10 + $0x3c4] ss:$24 sps:$4 sm:$0xff]  }
  0xf8   :  { %2235 = vmatprep.subr.bf16.mxu1 %v5611_v33  ;;  %v5687_v33 = vld [vmem:[#allocation10 + $0x6cc] ss:$24 sps:$4 sm:$0xff]   ;;  %v5715_v60 = vld [vmem:[#allocation10 + $0x7b8] ss:$24 sps:$4 sm:$0xff]  }
  0xfa   :  { %2072 = vmatpush1.bf16.msra.mxu0 %v5613_v34  ;;  %v5682_v34 = vld [vmem:[#allocation10 + $0x3c0] ss:$24 sps:$4 sm:$0xff]  }
  0xfb   :  { %2236 = vmatpush1.bf16.msra.mxu1 %v5614_v35  ;;  %2073 = vmatprep.subr.bf16.mxu0 %v5615_v39  ;;  %v5685_v35 = vld [vmem:[#allocation10 + $0x6c8] ss:$24 sps:$4 sm:$0xff]   ;;  %v5691_v39 = vld [vmem:[#allocation10 + $0x6f8] ss:$24 sps:$4 sm:$0xff]  }
  0xfc   :  { %2237 = vmatprep.subr.bf16.mxu1 %v5617_v40  ;;  %v5696_v40 = vld [vmem:[#allocation10 + $0x424] ss:$24 sps:$4 sm:$0xff]  }
  0xfe   :  { %2074 = vmatpush1.bf16.msra.mxu0 %v5619_v41  ;;  %v5699_v41 = vld [vmem:[#allocation10 + $0x72c] ss:$24 sps:$4 sm:$0xff]  }
  0xff   :  { %2238 = vmatpush1.bf16.msra.mxu1 %v5620_v44  ;;  %2075 = vmatprep.subr.bf16.mxu0 %v5621_v45  ;;  %v5694_v44 = vld [vmem:[#allocation10 + $0x420] ss:$24 sps:$4 sm:$0xff]  }
 0x100   :  { %2239 = vmatprep.subr.bf16.mxu1 %v5623_v46  ;;  %v5697_v45 = vld [vmem:[#allocation10 + $0x728] ss:$24 sps:$4 sm:$0xff]   ;;  %v282_v46 = vcombine.high %v7059_v43, %v7059_v43 }
 0x102   :  { %2076 = vmatpush1.bf16.msra.mxu0 %v5625_v47  ;;  %v5702_v47 = vld [vmem:[#allocation10 + $0x454] ss:$24 sps:$4 sm:$0xff]  }
 0x103   :  { %2240 = vmatpush1.bf16.msra.mxu1 %v5626_v48  ;;  %2077 = vmatprep.subr.bf16.mxu0 %v5627_v50  ;;  %v5705_v48 = vld [vmem:[#allocation10 + $0x75c] ss:$24 sps:$4 sm:$0xff]   ;;  %v7063_v50 = vpack.c.bf16 %v282_v46, %v282_v46 }
 0x104   :  { %2241 = vmatprep.subr.bf16.mxu1 %v5629_v51  ;;  %v5700_v51 = vld [vmem:[#allocation10 + $0x450] ss:$24 sps:$4 sm:$0xff]  }
 0x105   :  { %v5775_v46 = vld [vmem:[#allocation13 + $0x90] ss:$24 sps:$4 sm:$0xff]  }
 0x106   :  { %2078 = vmatpush1.bf16.msra.mxu0 %v5631_v53  ;;  %v5708_v53 = vld [vmem:[#allocation10 + $0x484] ss:$24 sps:$4 sm:$0xff]  }
 0x107   :  { %2242 = vmatpush1.bf16.msra.mxu1 %v5632_v56  ;;  %2079 = vmatprep.subr.bf16.mxu0 %v5633_v57  ;;  %v5709_v56 = vld [vmem:[#allocation10 + $0x788] ss:$24 sps:$4 sm:$0xff]   ;;  %v5714_v57 = vld [vmem:[#allocation10 + $0x4b4] ss:$24 sps:$4 sm:$0xff]  }
 0x108   :  { %2243 = vmatprep.subr.bf16.mxu1 %v5635_v58  ;;  %v5717_v58 = vld [vmem:[#allocation10 + $0x7bc] ss:$24 sps:$4 sm:$0xff]  }
 0x10a   :  { %2080 = vmatpush1.bf16.msra.mxu0 %v5637_v61  ;;  %v5720_v61 = vld [vmem:[#allocation10 + $0x4e4] ss:$24 sps:$4 sm:$0xff]  }
 0x10b   :  { %2244 = vmatpush1.bf16.msra.mxu1 %v5638_v0  ;;  %2081 = vmatprep.subr.bf16.mxu0 %v5639_v1  ;;  %v5718_v0 = vld [vmem:[#allocation10 + $0x4e0] ss:$24 sps:$4 sm:$0xff]  }
 0x10c   :  { %2245 = vmatprep.subr.bf16.mxu1 %v5641_v2  ;;  %v5721_v1 = vld [vmem:[#allocation10 + $0x7e8] ss:$24 sps:$4 sm:$0xff]   ;;  %v5726_v2 = vld [vmem:[#allocation10 + $0x514] ss:$24 sps:$4 sm:$0xff]  }
 0x10e   :  { %2082 = vmatpush1.bf16.msra.mxu0 %v5643_v4  ;;  %v5729_v4 = vld [vmem:[#allocation10 + $0x81c] ss:$24 sps:$4 sm:$0xff]  }
 0x10f   :  { %2246 = vmatpush1.bf16.msra.mxu1 %v5644_v5  ;;  %2083 = vmatprep.subr.bf16.mxu0 %v5645_v6  ;;  %v5724_v5 = vld [vmem:[#allocation10 + $0x510] ss:$24 sps:$4 sm:$0xff]  }
 0x110   :  { %2247 = vmatprep.subr.bf16.mxu1 %v5647_v7  ;;  %v5727_v6 = vld [vmem:[#allocation10 + $0x818] ss:$24 sps:$4 sm:$0xff]   ;;  %v5732_v7 = vld [vmem:[#allocation10 + $0x544] ss:$24 sps:$4 sm:$0xff]  }
 0x112   :  { %2084 = vmatpush1.bf16.msra.mxu0 %v5649_v8  ;;  %v5735_v8 = vld [vmem:[#allocation10 + $0x84c] ss:$24 sps:$4 sm:$0xff]  }
 0x113   :  { %2248 = vmatpush1.bf16.msra.mxu1 %v5650_v9  ;;  %2085 = vmatprep.subr.bf16.mxu0 %v5651_v10  ;;  %v5730_v9 = vld [vmem:[#allocation10 + $0x540] ss:$24 sps:$4 sm:$0xff]  }
 0x114   :  { %2249 = vmatprep.subr.bf16.mxu1 %v5653_v11  ;;  %v5733_v10 = vld [vmem:[#allocation10 + $0x848] ss:$24 sps:$4 sm:$0xff]   ;;  %v5738_v11 = vld [vmem:[#allocation10 + $0x574] ss:$24 sps:$4 sm:$0xff]  }
 0x116   :  { %2086 = vmatpush1.bf16.msra.mxu0 %v5655_v12  ;;  %v5741_v12 = vld [vmem:[#allocation10 + $0x87c] ss:$24 sps:$4 sm:$0xff]  }
 0x117   :  { %2250 = vmatpush1.bf16.msra.mxu1 %v5656_v13  ;;  %2096 = vmatprep.subr.bf16.mxu0 %v5659_v14  ;;  %v5736_v13 = vld [vmem:[#allocation10 + $0x570] ss:$24 sps:$4 sm:$0xff]  }
 0x118   :  { %2260 = vmatprep.subr.bf16.mxu1 %v5663_v15  ;;  %v5739_v14 = vld [vmem:[#allocation10 + $0x878] ss:$24 sps:$4 sm:$0xff]   ;;  %v5744_v15 = vld [vmem:[#allocation10 + $0x5a4] ss:$24 sps:$4 sm:$0xff]  }
 0x119   :  { %2088 = vmatmul.mubr.bf16.vlgmr.msra.gmra.mrb[0].mxu0 %v7052_v17 }
 0x11a   :  { %2252 = vmatmul.mubr.bf16.vlgmr.msra.gmra.mrb[0].mxu1 %v7054_v18  ;;  %2097 = vmatpush1.bf16.msra.mxu0 %v5657_v16  ;;  %v5747_v16 = vld [vmem:[#allocation10 + $0x8ac] ss:$24 sps:$4 sm:$0xff]  }
 0x11b   :  { %2261 = vmatpush1.bf16.msra.mxu1 %v5661_v19  ;;  %2098 = vmatprep.subr.bf16.mxu0 %v5666_v20  ;;  %v5742_v19 = vld [vmem:[#allocation10 + $0x5a0] ss:$24 sps:$4 sm:$0xff]  }
 0x11c   :  { %2262 = vmatprep.subr.bf16.mxu1 %v5669_v21  ;;  %2128 = vmatprep.mubr.bf16.mxu0 %v7048_v3  ;;  %v5745_v20 = vld [vmem:[#allocation10 + $0x8a8] ss:$24 sps:$4 sm:$0xff]   ;;  %v5750_v21 = vld [vmem:[#allocation10 + $0x5d4] ss:$24 sps:$4 sm:$0xff]  }
 0x11d   :  { %2292 = vmatprep.mubr.bf16.mxu1 %v7063_v50 }
 0x11e   :  { %2099 = vmatpush1.bf16.msra.mxu0 %v5664_v22  ;;  %v5753_v22 = vld [vmem:[#allocation10 + $0x8dc] ss:$24 sps:$4 sm:$0xff]  }
 0x11f   :  { %2263 = vmatpush1.bf16.msra.mxu1 %v5667_v23  ;;  %2100 = vmatprep.subr.bf16.mxu0 %v5672_v24  ;;  %v5748_v23 = vld [vmem:[#allocation10 + $0x5d0] ss:$24 sps:$4 sm:$0xff]  }
 0x120   :  { %2264 = vmatprep.subr.bf16.mxu1 %v5675_v25  ;;  %v5751_v24 = vld [vmem:[#allocation10 + $0x8d8] ss:$24 sps:$4 sm:$0xff]   ;;  %v5756_v25 = vld [vmem:[#allocation10 + $0x604] ss:$24 sps:$4 sm:$0xff]  }
 0x122   :  { %2101 = vmatpush1.bf16.msra.mxu0 %v5670_v26  ;;  %v5759_v26 = vld [vmem:[#allocation13 + $0x4] ss:$24 sps:$4 sm:$0xff]  }
 0x123   :  { %2265 = vmatpush1.bf16.msra.mxu1 %v5673_v27  ;;  %2102 = vmatprep.subr.bf16.mxu0 %v5678_v28  ;;  %v7068_v27 = vpack.c.bf16 %v7059_v43, %v7059_v43  ;;  %v5754_v28 = vld [vmem:[#allocation10 + $0x600] ss:$24 sps:$4 sm:$0xff]   ;;  %v5774_v43 = vld [vmem:[#allocation10 + $0x694] ss:$24 sps:$4 sm:$0xff]  }
 0x124   :  { %2266 = vmatprep.subr.bf16.mxu1 %v5681_v29  ;;  %v5757_v29 = vld [vmem:[#allocation13] ss:$24 sps:$4 sm:$0xff]  }
 0x126   :  { %2103 = vmatpush1.bf16.msra.mxu0 %v5676_v30  ;;  %v5762_v30 = vld [vmem:[#allocation10 + $0x634] ss:$24 sps:$4 sm:$0xff]  }
 0x127   :  { %2267 = vmatpush1.bf16.msra.mxu1 %v5679_v31  ;;  %2104 = vmatprep.subr.bf16.mxu0 %v5684_v32  ;;  %v5765_v31 = vld [vmem:[#allocation13 + $0x34] ss:$24 sps:$4 sm:$0xff]  }
 0x128   :  { %2268 = vmatprep.subr.bf16.mxu1 %v5687_v33  ;;  %v7070_v32 = vld [vmem:[#allocation7] sm:$0xff] }
 0x129   :  { %v5760_v33 = vld [vmem:[#allocation10 + $0x630] ss:$24 sps:$4 sm:$0xff]  }
 0x12a   :  { %2105 = vmatpush1.bf16.msra.mxu0 %v5682_v34  ;;  %v7076_v34 = vrot.slane %v7070_v32, %v7042_v49 }
 0x12b   :  { %2269 = vmatpush1.bf16.msra.mxu1 %v5685_v35  ;;  %2106 = vmatprep.subr.bf16.mxu0 %v5690_v36  ;;  %v5763_v35 = vld [vmem:[#allocation13 + $0x30] ss:$24 sps:$4 sm:$0xff]   ;;  %v5768_v36 = vld [vmem:[#allocation10 + $0x664] ss:$24 sps:$4 sm:$0xff]  }
 0x12c   :  { %2270 = vmatprep.subr.bf16.mxu1 %v5693_v37  ;;  %v5771_v37 = vld [vmem:[#allocation13 + $0x64] ss:$24 sps:$4 sm:$0xff]  }
 0x12e   :  { %2107 = vmatpush1.bf16.msra.mxu0 %v5688_v38  ;;  %v2447_v38 = vcombine.high %v7076_v34, %v7076_v34 }
 0x12f   :  { %2271 = vmatpush1.bf16.msra.mxu1 %v5691_v39  ;;  %2108 = vmatprep.subr.bf16.mxu0 %v5696_v40  ;;  %v5766_v39 = vld [vmem:[#allocation10 + $0x660] ss:$24 sps:$4 sm:$0xff]  }
 0x130   :  { %2272 = vmatprep.subr.bf16.mxu1 %v5699_v41  ;;  %v7081_v40 = vpack.c.bf16 %v2447_v38, %v2447_v38  ;;  %v5769_v41 = vld [vmem:[#allocation13 + $0x60] ss:$24 sps:$4 sm:$0xff]   ;;  %v5849_v38 = vld [vmem:[#allocation13 + $0x2d4] ss:$24 sps:$4 sm:$0xff]  }
 0x132   :  { %2109 = vmatpush1.bf16.msra.mxu0 %v5694_v44  ;;  %v5777_v44 = vld [vmem:[#allocation13 + $0x94] ss:$24 sps:$4 sm:$0xff]  }
 0x133   :  { %2273 = vmatpush1.bf16.msra.mxu1 %v5697_v45  ;;  %2110 = vmatprep.subr.bf16.mxu0 %v5702_v47  ;;  %v5772_v45 = vld [vmem:[#allocation10 + $0x690] ss:$24 sps:$4 sm:$0xff]   ;;  %v5780_v47 = vld [vmem:[#allocation10 + $0x6c4] ss:$24 sps:$4 sm:$0xff]  }
 0x134   :  { %2274 = vmatprep.subr.bf16.mxu1 %v5705_v48  ;;  %v5783_v48 = vld [vmem:[#allocation13 + $0xc4] ss:$24 sps:$4 sm:$0xff]  }
 0x136   :  { %2111 = vmatpush1.bf16.msra.mxu0 %v5700_v51  ;;  %v5778_v51 = vld [vmem:[#allocation10 + $0x6c0] ss:$24 sps:$4 sm:$0xff]  }
 0x137   :  { %2275 = vmatpush1.bf16.msra.mxu1 %v5703_v52  ;;  %2112 = vmatprep.subr.bf16.mxu0 %v5708_v53  ;;  %v5781_v52 = vld [vmem:[#allocation13 + $0xc0] ss:$24 sps:$4 sm:$0xff]   ;;  %v5786_v53 = vld [vmem:[#allocation10 + $0x6f4] ss:$24 sps:$4 sm:$0xff]  }
 0x138   :  { %2276 = vmatprep.subr.bf16.mxu1 %v5711_v54  ;;  %v5789_v54 = vld [vmem:[#allocation13 + $0xf4] ss:$24 sps:$4 sm:$0xff]  }
 0x13a   :  { %2113 = vmatpush1.bf16.msra.mxu0 %v5706_v55  ;;  %v5784_v55 = vld [vmem:[#allocation10 + $0x6f0] ss:$24 sps:$4 sm:$0xff]  }
 0x13b   :  { %2277 = vmatpush1.bf16.msra.mxu1 %v5709_v56  ;;  %2114 = vmatprep.subr.bf16.mxu0 %v5714_v57  ;;  %v5787_v56 = vld [vmem:[#allocation13 + $0xf0] ss:$24 sps:$4 sm:$0xff]   ;;  %v5792_v57 = vld [vmem:[#allocation10 + $0x724] ss:$24 sps:$4 sm:$0xff]  }
 0x13c   :  { %2278 = vmatprep.subr.bf16.mxu1 %v5717_v58  ;;  %v5795_v58 = vld [vmem:[#allocation13 + $0x124] ss:$24 sps:$4 sm:$0xff]  }
 0x13e   :  { %2115 = vmatpush1.bf16.msra.mxu0 %v5712_v59  ;;  %v5790_v59 = vld [vmem:[#allocation10 + $0x720] ss:$24 sps:$4 sm:$0xff]  }
 0x13f   :  { %2279 = vmatpush1.bf16.msra.mxu1 %v5715_v60  ;;  %2116 = vmatprep.subr.bf16.mxu0 %v5720_v61  ;;  %v5793_v60 = vld [vmem:[#allocation13 + $0x120] ss:$24 sps:$4 sm:$0xff]   ;;  %v5798_v61 = vld [vmem:[#allocation10 + $0x754] ss:$24 sps:$4 sm:$0xff]  }
 0x140   :  { %2280 = vmatprep.subr.bf16.mxu1 %v5723_v63  ;;  %v5801_v63 = vld [vmem:[#allocation13 + $0x154] ss:$24 sps:$4 sm:$0xff]  }
 0x142   :  { %2117 = vmatpush1.bf16.msra.mxu0 %v5718_v0  ;;  %v5796_v0 = vld [vmem:[#allocation10 + $0x750] ss:$24 sps:$4 sm:$0xff]  }
 0x143   :  { %2281 = vmatpush1.bf16.msra.mxu1 %v5721_v1  ;;  %2118 = vmatprep.subr.bf16.mxu0 %v5726_v2  ;;  %v5799_v1 = vld [vmem:[#allocation13 + $0x150] ss:$24 sps:$4 sm:$0xff]   ;;  %v5804_v2 = vld [vmem:[#allocation10 + $0x784] ss:$24 sps:$4 sm:$0xff]  }
 0x144   :  { %2282 = vmatprep.subr.bf16.mxu1 %v5729_v4  ;;  %v5807_v4 = vld [vmem:[#allocation13 + $0x184] ss:$24 sps:$4 sm:$0xff]  }
 0x146   :  { %2119 = vmatpush1.bf16.msra.mxu0 %v5724_v5  ;;  %v5802_v5 = vld [vmem:[#allocation10 + $0x780] ss:$24 sps:$4 sm:$0xff]  }
 0x147   :  { %2283 = vmatpush1.bf16.msra.mxu1 %v5727_v6  ;;  %2120 = vmatprep.subr.bf16.mxu0 %v5732_v7  ;;  %v5805_v6 = vld [vmem:[#allocation13 + $0x180] ss:$24 sps:$4 sm:$0xff]   ;;  %v5810_v7 = vld [vmem:[#allocation10 + $0x7b4] ss:$24 sps:$4 sm:$0xff]  }
 0x148   :  { %2284 = vmatprep.subr.bf16.mxu1 %v5735_v8  ;;  %v5813_v8 = vld [vmem:[#allocation13 + $0x1b4] ss:$24 sps:$4 sm:$0xff]  }
 0x14a   :  { %2121 = vmatpush1.bf16.msra.mxu0 %v5730_v9  ;;  %v5808_v9 = vld [vmem:[#allocation10 + $0x7b0] ss:$24 sps:$4 sm:$0xff]  }
 0x14b   :  { %2285 = vmatpush1.bf16.msra.mxu1 %v5733_v10  ;;  %2122 = vmatprep.subr.bf16.mxu0 %v5738_v11  ;;  %v5811_v10 = vld [vmem:[#allocation13 + $0x1b0] ss:$24 sps:$4 sm:$0xff]   ;;  %v5816_v11 = vld [vmem:[#allocation10 + $0x7e4] ss:$24 sps:$4 sm:$0xff]  }
 0x14c   :  { %2286 = vmatprep.subr.bf16.mxu1 %v5741_v12  ;;  %v5819_v12 = vld [vmem:[#allocation13 + $0x1e4] ss:$24 sps:$4 sm:$0xff]  }
 0x14e   :  { %2123 = vmatpush1.bf16.msra.mxu0 %v5736_v13  ;;  %v5814_v13 = vld [vmem:[#allocation10 + $0x7e0] ss:$24 sps:$4 sm:$0xff]  }
 0x14f   :  { %2287 = vmatpush1.bf16.msra.mxu1 %v5739_v14  ;;  %2124 = vmatprep.subr.bf16.mxu0 %v5744_v15  ;;  %v5817_v14 = vld [vmem:[#allocation13 + $0x1e0] ss:$24 sps:$4 sm:$0xff]   ;;  %v5822_v15 = vld [vmem:[#allocation10 + $0x814] ss:$24 sps:$4 sm:$0xff]  }
 0x150   :  { %2288 = vmatprep.subr.bf16.mxu1 %v5747_v16  ;;  %v5825_v16 = vld [vmem:[#allocation13 + $0x214] ss:$24 sps:$4 sm:$0xff]  }
 0x152   :  { %2125 = vmatpush1.bf16.msra.mxu0 %v5742_v19  ;;  %v5820_v19 = vld [vmem:[#allocation10 + $0x810] ss:$24 sps:$4 sm:$0xff]  }
 0x153   :  { %2289 = vmatpush1.bf16.msra.mxu1 %v5745_v20  ;;  %2126 = vmatprep.subr.bf16.mxu0 %v5750_v21  ;;  %v5823_v20 = vld [vmem:[#allocation13 + $0x210] ss:$24 sps:$4 sm:$0xff]   ;;  %v5828_v21 = vld [vmem:[#allocation10 + $0x844] ss:$24 sps:$4 sm:$0xff]  }
 0x154   :  { %2290 = vmatprep.subr.bf16.mxu1 %v5753_v22  ;;  %v5831_v22 = vld [vmem:[#allocation13 + $0x244] ss:$24 sps:$4 sm:$0xff]  }
 0x156   :  { %2127 = vmatpush1.bf16.msra.mxu0 %v5748_v23  ;;  %v5826_v23 = vld [vmem:[#allocation10 + $0x840] ss:$24 sps:$4 sm:$0xff]  }
 0x157   :  { %2291 = vmatpush1.bf16.msra.mxu1 %v5751_v24  ;;  %2137 = vmatprep.subr.bf16.mxu0 %v5756_v25  ;;  %v5829_v24 = vld [vmem:[#allocation13 + $0x240] ss:$24 sps:$4 sm:$0xff]   ;;  %v5834_v25 = vld [vmem:[#allocation10 + $0x874] ss:$24 sps:$4 sm:$0xff]  }
 0x158   :  { %3641 = vmatprep.subr.bf16.mxu1 %v5759_v26  ;;  %v5837_v26 = vld [vmem:[#allocation13 + $0x274] ss:$24 sps:$4 sm:$0xff]  }
 0x159   :  { %2129 = vmatmul.mubr.bf16.vlgmr.msra.gmra.mrb[0].mxu0 %v7054_v18 }
 0x15a   :  { %2293 = vmatmul.mubr.bf16.vlgmr.msra.gmra.mrb[0].mxu1 %v7068_v27  ;;  %2138 = vmatpush1.bf16.msra.mxu0 %v5754_v28  ;;  %v5832_v28 = vld [vmem:[#allocation10 + $0x870] ss:$24 sps:$4 sm:$0xff]  }
 0x15b   :  { %3642 = vmatpush1.bf16.msra.mxu1 %v5757_v29  ;;  %2139 = vmatprep.subr.bf16.mxu0 %v5762_v30  ;;  %v5835_v29 = vld [vmem:[#allocation13 + $0x270] ss:$24 sps:$4 sm:$0xff]   ;;  %v5840_v30 = vld [vmem:[#allocation10 + $0x8a4] ss:$24 sps:$4 sm:$0xff]  }
 0x15c   :  { %3643 = vmatprep.subr.bf16.mxu1 %v5765_v31  ;;  %2169 = vmatprep.mubr.bf16.mxu0 %v7063_v50  ;;  %v5843_v31 = vld [vmem:[#allocation13 + $0x2a4] ss:$24 sps:$4 sm:$0xff]  }
 0x15d   :  { %3673 = vmatprep.mubr.bf16.mxu1 %v7081_v40 }
 0x15e   :  { %2140 = vmatpush1.bf16.msra.mxu0 %v5760_v33  ;;  %v2432_v33 = vcombine.high %v7070_v32, %v7070_v32 }
 0x15f   :  { %3644 = vmatpush1.bf16.msra.mxu1 %v5763_v35  ;;  %2141 = vmatprep.subr.bf16.mxu0 %v5768_v36  ;;  %v5838_v35 = vld [vmem:[#allocation10 + $0x8a0] ss:$24 sps:$4 sm:$0xff]  }
 0x160   :  { %3645 = vmatprep.subr.bf16.mxu1 %v5771_v37  ;;  %v5841_v36 = vld [vmem:[#allocation13 + $0x2a0] ss:$24 sps:$4 sm:$0xff]   ;;  %v5846_v37 = vld [vmem:[#allocation10 + $0x8d4] ss:$24 sps:$4 sm:$0xff]  }
 0x162   :  { %2142 = vmatpush1.bf16.msra.mxu0 %v5766_v39  ;;  %v7087_v39 = vrot.slane %v2432_v33, %v7042_v49  ;;  %v5918_v33 = vld [vmem:[#allocation10 + $0x21c] ss:$24 sps:$4 sm:$0xff]  }
 0x163   :  { %3646 = vmatpush1.bf16.msra.mxu1 %v5769_v41  ;;  %2143 = vmatprep.subr.bf16.mxu0 %v5774_v43  ;;  %v5844_v41 = vld [vmem:[#allocation10 + $0x8d0] ss:$24 sps:$4 sm:$0xff]  }
 0x164   :  { %3647 = vmatprep.subr.bf16.mxu1 %v5777_v44  ;;  %v5847_v43 = vld [vmem:[#allocation13 + $0x2d0] ss:$24 sps:$4 sm:$0xff]   ;;  %v2448_v32 = vcombine.high %v7087_v39, %v7087_v39 }
 0x165   :  { %v5852_v44 = vld [vmem:[#allocation10 + $0xc] ss:$24 sps:$4 sm:$0xff]  }
 0x166   :  { %2144 = vmatpush1.bf16.msra.mxu0 %v5772_v45  ;;  %v5855_v45 = vld [vmem:[#allocation13 + $0x304] ss:$24 sps:$4 sm:$0xff]  }
 0x167   :  { %3648 = vmatpush1.bf16.msra.mxu1 %v5775_v46  ;;  %2145 = vmatprep.subr.bf16.mxu0 %v5780_v47  ;;  %v5850_v46 = vld [vmem:[#allocation10 + $0x8] ss:$24 sps:$4 sm:$0xff]   ;;  %v7093_v47 = vpack.c.bf16 %v7076_v34, %v7076_v34 }
 0x168   :  { %3649 = vmatprep.subr.bf16.mxu1 %v5783_v48  ;;  %v5853_v48 = vld [vmem:[#allocation13 + $0x300] ss:$24 sps:$4 sm:$0xff]   ;;  %v5867_v34 = vld [vmem:[#allocation13 + $0x364] ss:$24 sps:$4 sm:$0xff]  }
 0x16a   :  { %2146 = vmatpush1.bf16.msra.mxu0 %v5778_v51  ;;  %v5858_v51 = vld [vmem:[#allocation10 + $0x3c] ss:$24 sps:$4 sm:$0xff]  }
 0x16b   :  { %3650 = vmatpush1.bf16.msra.mxu1 %v5781_v52  ;;  %2147 = vmatprep.subr.bf16.mxu0 %v5786_v53  ;;  %v5861_v52 = vld [vmem:[#allocation13 + $0x334] ss:$24 sps:$4 sm:$0xff]   ;;  %v7095_v53 = vpack.c.bf16 %v2448_v32, %v2448_v32 }
 0x16c   :  { %3651 = vmatprep.subr.bf16.mxu1 %v5789_v54  ;;  %v5856_v54 = vld [vmem:[#allocation10 + $0x38] ss:$24 sps:$4 sm:$0xff]  }
 0x16d   :  { %v5933_v32 = vld [vmem:[#allocation13 + $0x574] ss:$24 sps:$4 sm:$0xff]  }
 0x16e   :  { %2148 = vmatpush1.bf16.msra.mxu0 %v5784_v55  ;;  %v5859_v55 = vld [vmem:[#allocation13 + $0x330] ss:$24 sps:$4 sm:$0xff]  }
 0x16f   :  { %3652 = vmatpush1.bf16.msra.mxu1 %v5787_v56  ;;  %2149 = vmatprep.subr.bf16.mxu0 %v5792_v57  ;;  %v5864_v56 = vld [vmem:[#allocation10 + $0x6c] ss:$24 sps:$4 sm:$0xff]   ;;  %v5862_v57 = vld [vmem:[#allocation10 + $0x68] ss:$24 sps:$4 sm:$0xff]  }
 0x170   :  { %3653 = vmatprep.subr.bf16.mxu1 %v5795_v58  ;;  %v5865_v58 = vld [vmem:[#allocation13 + $0x360] ss:$24 sps:$4 sm:$0xff]  }
 0x172   :  { %2150 = vmatpush1.bf16.msra.mxu0 %v5790_v59  ;;  %v5870_v59 = vld [vmem:[#allocation10 + $0x9c] ss:$24 sps:$4 sm:$0xff]  }
 0x173   :  { %3654 = vmatpush1.bf16.msra.mxu1 %v5793_v60  ;;  %2151 = vmatprep.subr.bf16.mxu0 %v5798_v61  ;;  %v5873_v60 = vld [vmem:[#allocation13 + $0x394] ss:$24 sps:$4 sm:$0xff]  }
 0x174   :  { %3655 = vmatprep.subr.bf16.mxu1 %v5801_v63  ;;  %v5868_v61 = vld [vmem:[#allocation10 + $0x98] ss:$24 sps:$4 sm:$0xff]  }
 0x175   :  { %v5871_v63 = vld [vmem:[#allocation13 + $0x390] ss:$24 sps:$4 sm:$0xff]  }
 0x176   :  { %2152 = vmatpush1.bf16.msra.mxu0 %v5796_v0  ;;  %v5876_v0 = vld [vmem:[#allocation10 + $0xcc] ss:$24 sps:$4 sm:$0xff]  }
 0x177   :  { %3656 = vmatpush1.bf16.msra.mxu1 %v5799_v1  ;;  %2153 = vmatprep.subr.bf16.mxu0 %v5804_v2  ;;  %v5879_v1 = vld [vmem:[#allocation13 + $0x3c4] ss:$24 sps:$4 sm:$0xff]  }
 0x178   :  { %3657 = vmatprep.subr.bf16.mxu1 %v5807_v4  ;;  %v5874_v2 = vld [vmem:[#allocation10 + $0xc8] ss:$24 sps:$4 sm:$0xff]  }
 0x179   :  { %v5877_v4 = vld [vmem:[#allocation13 + $0x3c0] ss:$24 sps:$4 sm:$0xff]  }
 0x17a   :  { %2154 = vmatpush1.bf16.msra.mxu0 %v5802_v5  ;;  %v5882_v5 = vld [vmem:[#allocation10 + $0xfc] ss:$24 sps:$4 sm:$0xff]  }
 0x17b   :  { %3658 = vmatpush1.bf16.msra.mxu1 %v5805_v6  ;;  %2155 = vmatprep.subr.bf16.mxu0 %v5810_v7  ;;  %v5885_v6 = vld [vmem:[#allocation13 + $0x3f4] ss:$24 sps:$4 sm:$0xff]  }
 0x17c   :  { %3659 = vmatprep.subr.bf16.mxu1 %v5813_v8  ;;  %v5880_v7 = vld [vmem:[#allocation10 + $0xf8] ss:$24 sps:$4 sm:$0xff]  }
 0x17d   :  { %v5883_v8 = vld [vmem:[#allocation13 + $0x3f0] ss:$24 sps:$4 sm:$0xff]  }
 0x17e   :  { %2156 = vmatpush1.bf16.msra.mxu0 %v5808_v9  ;;  %v5888_v9 = vld [vmem:[#allocation10 + $0x12c] ss:$24 sps:$4 sm:$0xff]  }
 0x17f   :  { %3660 = vmatpush1.bf16.msra.mxu1 %v5811_v10  ;;  %2157 = vmatprep.subr.bf16.mxu0 %v5816_v11  ;;  %v5891_v10 = vld [vmem:[#allocation13 + $0x424] ss:$24 sps:$4 sm:$0xff]  }
 0x180   :  { %3661 = vmatprep.subr.bf16.mxu1 %v5819_v12  ;;  %v5886_v11 = vld [vmem:[#allocation10 + $0x128] ss:$24 sps:$4 sm:$0xff]  }
 0x181   :  { %v5889_v12 = vld [vmem:[#allocation13 + $0x420] ss:$24 sps:$4 sm:$0xff]  }
 0x182   :  { %2158 = vmatpush1.bf16.msra.mxu0 %v5814_v13  ;;  %v5894_v13 = vld [vmem:[#allocation10 + $0x15c] ss:$24 sps:$4 sm:$0xff]  }
 0x183   :  { %3662 = vmatpush1.bf16.msra.mxu1 %v5817_v14  ;;  %2159 = vmatprep.subr.bf16.mxu0 %v5822_v15  ;;  %v5897_v14 = vld [vmem:[#allocation13 + $0x454] ss:$24 sps:$4 sm:$0xff]  }
 0x184   :  { %3663 = vmatprep.subr.bf16.mxu1 %v5825_v16  ;;  %v5892_v15 = vld [vmem:[#allocation10 + $0x158] ss:$24 sps:$4 sm:$0xff]  }
 0x185   :  { %v5895_v16 = vld [vmem:[#allocation13 + $0x450] ss:$24 sps:$4 sm:$0xff]  }
 0x186   :  { %2160 = vmatpush1.bf16.msra.mxu0 %v5820_v19  ;;  %v5900_v19 = vld [vmem:[#allocation10 + $0x18c] ss:$24 sps:$4 sm:$0xff]  }
 0x187   :  { %3664 = vmatpush1.bf16.msra.mxu1 %v5823_v20  ;;  %2161 = vmatprep.subr.bf16.mxu0 %v5828_v21  ;;  %v5903_v20 = vld [vmem:[#allocation13 + $0x484] ss:$24 sps:$4 sm:$0xff]  }
 0x188   :  { %3665 = vmatprep.subr.bf16.mxu1 %v5831_v22  ;;  %v5898_v21 = vld [vmem:[#allocation10 + $0x188] ss:$24 sps:$4 sm:$0xff]  }
 0x189   :  { %v5901_v22 = vld [vmem:[#allocation13 + $0x480] ss:$24 sps:$4 sm:$0xff]  }
 0x18a   :  { %2162 = vmatpush1.bf16.msra.mxu0 %v5826_v23  ;;  %v5906_v23 = vld [vmem:[#allocation10 + $0x1bc] ss:$24 sps:$4 sm:$0xff]  }
 0x18b   :  { %3666 = vmatpush1.bf16.msra.mxu1 %v5829_v24  ;;  %2163 = vmatprep.subr.bf16.mxu0 %v5834_v25  ;;  %v5909_v24 = vld [vmem:[#allocation13 + $0x4b4] ss:$24 sps:$4 sm:$0xff]  }
 0x18c   :  { %3667 = vmatprep.subr.bf16.mxu1 %v5837_v26  ;;  %v5904_v25 = vld [vmem:[#allocation10 + $0x1b8] ss:$24 sps:$4 sm:$0xff]  }
 0x18d   :  { %v5907_v26 = vld [vmem:[#allocation13 + $0x4b0] ss:$24 sps:$4 sm:$0xff]  }
 0x18e   :  { %2164 = vmatpush1.bf16.msra.mxu0 %v5832_v28  ;;  %v5912_v28 = vld [vmem:[#allocation10 + $0x1ec] ss:$24 sps:$4 sm:$0xff]  }
 0x18f   :  { %3668 = vmatpush1.bf16.msra.mxu1 %v5835_v29  ;;  %2165 = vmatprep.subr.bf16.mxu0 %v5840_v30  ;;  %v5915_v29 = vld [vmem:[#allocation13 + $0x4e4] ss:$24 sps:$4 sm:$0xff]  }
 0x190   :  { %3669 = vmatprep.subr.bf16.mxu1 %v5843_v31  ;;  %v5910_v30 = vld [vmem:[#allocation10 + $0x1e8] ss:$24 sps:$4 sm:$0xff]  }
 0x191   :  { %v5913_v31 = vld [vmem:[#allocation13 + $0x4e0] ss:$24 sps:$4 sm:$0xff]  }
 0x192   :  { %2166 = vmatpush1.bf16.msra.mxu0 %v5838_v35  ;;  %v5921_v35 = vld [vmem:[#allocation13 + $0x514] ss:$24 sps:$4 sm:$0xff]  }
 0x193   :  { %3670 = vmatpush1.bf16.msra.mxu1 %v5841_v36  ;;  %2167 = vmatprep.subr.bf16.mxu0 %v5846_v37  ;;  %v5916_v36 = vld [vmem:[#allocation10 + $0x218] ss:$24 sps:$4 sm:$0xff]  }
 0x194   :  { %3671 = vmatprep.subr.bf16.mxu1 %v5849_v38  ;;  %v5919_v37 = vld [vmem:[#allocation13 + $0x510] ss:$24 sps:$4 sm:$0xff]  }
 0x195   :  { %v5924_v38 = vld [vmem:[#allocation10 + $0x24c] ss:$24 sps:$4 sm:$0xff]  }
 0x196   :  { %2168 = vmatpush1.bf16.msra.mxu0 %v5844_v41  ;;  %v5927_v41 = vld [vmem:[#allocation13 + $0x544] ss:$24 sps:$4 sm:$0xff]  }
 0x197   :  { %3672 = vmatpush1.bf16.msra.mxu1 %v5847_v43  ;;  %2178 = vmatprep.subr.bf16.mxu0 %v5852_v44  ;;  %v5922_v43 = vld [vmem:[#allocation10 + $0x248] ss:$24 sps:$4 sm:$0xff]  }
 0x198   :  { %3682 = vmatprep.subr.bf16.mxu1 %v5855_v45  ;;  %v5925_v44 = vld [vmem:[#allocation13 + $0x540] ss:$24 sps:$4 sm:$0xff]  }
 0x199   :  { %2170 = vmatmul.mubr.bf16.vlgmr.msra.gmra.mrb[0].mxu0 %v7068_v27  ;;  %v5930_v45 = vld [vmem:[#allocation10 + $0x27c] ss:$24 sps:$4 sm:$0xff]  }
 0x19a   :  { %3674 = vmatmul.mubr.bf16.vlgmr.msra.gmra.mrb[4].mxu1 %v7093_v47  ;;  %2179 = vmatpush1.bf16.msra.mxu0 %v5850_v46  ;;  %v5928_v46 = vld [vmem:[#allocation10 + $0x278] ss:$24 sps:$4 sm:$0xff]  }
 0x19b   :  { %3683 = vmatpush1.bf16.msra.mxu1 %v5853_v48  ;;  %2180 = vmatprep.subr.bf16.mxu0 %v5858_v51  ;;  %v5931_v48 = vld [vmem:[#allocation13 + $0x570] ss:$24 sps:$4 sm:$0xff]  }
 0x19c   :  { %3684 = vmatprep.subr.bf16.mxu1 %v5861_v52  ;;  %2210 = vmatprep.mubr.bf16.mxu0 %v7046_v62  ;;  %v5936_v51 = vld [vmem:[#allocation10 + $0x2ac] ss:$24 sps:$4 sm:$0xff]  }
 0x19d   :  { %3714 = vmatprep.mubr.bf16.mxu1 %v7095_v53  ;;  %v5939_v52 = vld [vmem:[#allocation13 + $0x5a4] ss:$24 sps:$4 sm:$0xff]  }
 0x19e   :  { %2181 = vmatpush1.bf16.msra.mxu0 %v5856_v54  ;;  %v5934_v54 = vld [vmem:[#allocation10 + $0x2a8] ss:$24 sps:$4 sm:$0xff]  }
 0x19f   :  { %3685 = vmatpush1.bf16.msra.mxu1 %v5859_v55  ;;  %2182 = vmatprep.subr.bf16.mxu0 %v5864_v56  ;;  %v5937_v55 = vld [vmem:[#allocation13 + $0x5a0] ss:$24 sps:$4 sm:$0xff]  }
 0x1a0   :  { %3686 = vmatprep.subr.bf16.mxu1 %v5867_v34  ;;  %v5942_v56 = vld [vmem:[#allocation10 + $0x2dc] ss:$24 sps:$4 sm:$0xff]  }
 0x1a1   :  { %v5945_v34 = vld [vmem:[#allocation13 + $0x5d4] ss:$24 sps:$4 sm:$0xff]  }
 0x1a2   :  { %2183 = vmatpush1.bf16.msra.mxu0 %v5862_v57  ;;  %v5940_v57 = vld [vmem:[#allocation10 + $0x2d8] ss:$24 sps:$4 sm:$0xff]  }
 0x1a3   :  { %3687 = vmatpush1.bf16.msra.mxu1 %v5865_v58  ;;  %2184 = vmatprep.subr.bf16.mxu0 %v5870_v59  ;;  %v5943_v58 = vld [vmem:[#allocation13 + $0x5d0] ss:$24 sps:$4 sm:$0xff]  }
 0x1a4   :  { %3688 = vmatprep.subr.bf16.mxu1 %v5873_v60  ;;  %v5949_v59 = vld [vmem:[#allocation10 + $0x14] ss:$24 sps:$4 sm:$0xff]  }
 0x1a5   :  { %v5952_v60 = vld [vmem:[#allocation13 + $0xc] ss:$24 sps:$4 sm:$0xff]  }
 0x1a6   :  { %2185 = vmatpush1.bf16.msra.mxu0 %v5868_v61  ;;  %v5947_v61 = vld [vmem:[#allocation10 + $0x10] ss:$24 sps:$4 sm:$0xff]  }
 0x1a7   :  { %3689 = vmatpush1.bf16.msra.mxu1 %v5871_v63  ;;  %2186 = vmatprep.subr.bf16.mxu0 %v5876_v0  ;;  %v7103_v63 = vpack.c.bf16 %v7087_v39, %v7087_v39  ;;  %v5950_v0 = vld [vmem:[#allocation13 + $0x8] ss:$24 sps:$4 sm:$0xff]  }
 0x1a8   :  { %3690 = vmatprep.subr.bf16.mxu1 %v5879_v1  ;;  %v5955_v1 = vld [vmem:[#allocation10 + $0x44] ss:$24 sps:$4 sm:$0xff]   ;;  %v5959_v39 = vld [vmem:[#allocation10 + $0x70] ss:$24 sps:$4 sm:$0xff]  }
 0x1aa   :  { %2187 = vmatpush1.bf16.msra.mxu0 %v5874_v2  ;;  %v5958_v2 = vld [vmem:[#allocation13 + $0x3c] ss:$24 sps:$4 sm:$0xff]  }
 0x1ab   :  { %3691 = vmatpush1.bf16.msra.mxu1 %v5877_v4  ;;  %2188 = vmatprep.subr.bf16.mxu0 %v5882_v5  ;;  %v5953_v4 = vld [vmem:[#allocation10 + $0x40] ss:$24 sps:$4 sm:$0xff]  }
 0x1ac   :  { %3692 = vmatprep.subr.bf16.mxu1 %v5885_v6  ;;  %v5956_v5 = vld [vmem:[#allocation13 + $0x38] ss:$24 sps:$4 sm:$0xff]  }
 0x1ad   :  { %v5961_v6 = vld [vmem:[#allocation10 + $0x74] ss:$24 sps:$4 sm:$0xff]  }
 0x1ae   :  { %2189 = vmatpush1.bf16.msra.mxu0 %v5880_v7  ;;  %v5964_v7 = vld [vmem:[#allocation13 + $0x6c] ss:$24 sps:$4 sm:$0xff]  }
 0x1af   :  { %3693 = vmatpush1.bf16.msra.mxu1 %v5883_v8  ;;  %2190 = vmatprep.subr.bf16.mxu0 %v5888_v9  ;;  %v5962_v8 = vld [vmem:[#allocation13 + $0x68] ss:$24 sps:$4 sm:$0xff]  }
 0x1b0   :  { %3694 = vmatprep.subr.bf16.mxu1 %v5891_v10  ;;  %v5967_v9 = vld [vmem:[#allocation10 + $0xa4] ss:$24 sps:$4 sm:$0xff]  }
 0x1b1   :  { %v5970_v10 = vld [vmem:[#allocation13 + $0x9c] ss:$24 sps:$4 sm:$0xff]  }
 0x1b2   :  { %2191 = vmatpush1.bf16.msra.mxu0 %v5886_v11  ;;  %v5965_v11 = vld [vmem:[#allocation10 + $0xa0] ss:$24 sps:$4 sm:$0xff]  }
 0x1b3   :  { %3695 = vmatpush1.bf16.msra.mxu1 %v5889_v12  ;;  %2192 = vmatprep.subr.bf16.mxu0 %v5894_v13  ;;  %v5968_v12 = vld [vmem:[#allocation13 + $0x98] ss:$24 sps:$4 sm:$0xff]  }
 0x1b4   :  { %3696 = vmatprep.subr.bf16.mxu1 %v5897_v14  ;;  %v5973_v13 = vld [vmem:[#allocation10 + $0xd4] ss:$24 sps:$4 sm:$0xff]  }
 0x1b5   :  { %v5976_v14 = vld [vmem:[#allocation13 + $0xcc] ss:$24 sps:$4 sm:$0xff]  }
 0x1b6   :  { %2193 = vmatpush1.bf16.msra.mxu0 %v5892_v15  ;;  %v5971_v15 = vld [vmem:[#allocation10 + $0xd0] ss:$24 sps:$4 sm:$0xff]  }
 0x1b7   :  { %3697 = vmatpush1.bf16.msra.mxu1 %v5895_v16  ;;  %2194 = vmatprep.subr.bf16.mxu0 %v5900_v19  ;;  %v5974_v16 = vld [vmem:[#allocation13 + $0xc8] ss:$24 sps:$4 sm:$0xff]   ;;  %v5982_v19 = vld [vmem:[#allocation13 + $0xfc] ss:$24 sps:$4 sm:$0xff]  }
 0x1b8   :  { %3698 = vmatprep.subr.bf16.mxu1 %v5903_v20  ;;  %v5977_v20 = vld [vmem:[#allocation10 + $0x100] ss:$24 sps:$4 sm:$0xff]  }
 0x1ba   :  { %2195 = vmatpush1.bf16.msra.mxu0 %v5898_v21  ;;  %v5980_v21 = vld [vmem:[#allocation13 + $0xf8] ss:$24 sps:$4 sm:$0xff]  }
 0x1bb   :  { %3699 = vmatpush1.bf16.msra.mxu1 %v5901_v22  ;;  %2196 = vmatprep.subr.bf16.mxu0 %v5906_v23  ;;  %v5985_v22 = vld [vmem:[#allocation10 + $0x134] ss:$24 sps:$4 sm:$0xff]  }
 0x1bc   :  { %3700 = vmatprep.subr.bf16.mxu1 %v5909_v24  ;;  %v5988_v23 = vld [vmem:[#allocation13 + $0x12c] ss:$24 sps:$4 sm:$0xff]  }
 0x1bd   :  { %v5983_v24 = vld [vmem:[#allocation10 + $0x130] ss:$24 sps:$4 sm:$0xff]  }
 0x1be   :  { %2197 = vmatpush1.bf16.msra.mxu0 %v5904_v25  ;;  %v5986_v25 = vld [vmem:[#allocation13 + $0x128] ss:$24 sps:$4 sm:$0xff]  }
 0x1bf   :  { %3701 = vmatpush1.bf16.msra.mxu1 %v5907_v26  ;;  %2198 = vmatprep.subr.bf16.mxu0 %v5912_v28  ;;  %v5991_v26 = vld [vmem:[#allocation10 + $0x164] ss:$24 sps:$4 sm:$0xff]  }
 0x1c0   :  { %3702 = vmatprep.subr.bf16.mxu1 %v5915_v29  ;;  %v5994_v28 = vld [vmem:[#allocation13 + $0x15c] ss:$24 sps:$4 sm:$0xff]  }
 0x1c1   :  { %v5989_v29 = vld [vmem:[#allocation10 + $0x160] ss:$24 sps:$4 sm:$0xff]  }
 0x1c2   :  { %2199 = vmatpush1.bf16.msra.mxu0 %v5910_v30  ;;  %v5992_v30 = vld [vmem:[#allocation13 + $0x158] ss:$24 sps:$4 sm:$0xff]  }
 0x1c3   :  { %3703 = vmatpush1.bf16.msra.mxu1 %v5913_v31  ;;  %2200 = vmatprep.subr.bf16.mxu0 %v5918_v33  ;;  %v5997_v31 = vld [vmem:[#allocation10 + $0x194] ss:$24 sps:$4 sm:$0xff]  }
 0x1c4   :  { %3704 = vmatprep.subr.bf16.mxu1 %v5921_v35  ;;  %v6000_v33 = vld [vmem:[#allocation13 + $0x18c] ss:$24 sps:$4 sm:$0xff]  }
 0x1c5   :  { %v5995_v35 = vld [vmem:[#allocation10 + $0x190] ss:$24 sps:$4 sm:$0xff]  }
 0x1c6   :  { %2201 = vmatpush1.bf16.msra.mxu0 %v5916_v36  ;;  %v5998_v36 = vld [vmem:[#allocation13 + $0x188] ss:$24 sps:$4 sm:$0xff]  }
 0x1c7   :  { %3705 = vmatpush1.bf16.msra.mxu1 %v5919_v37  ;;  %2202 = vmatprep.subr.bf16.mxu0 %v5924_v38  ;;  %v6003_v37 = vld [vmem:[#allocation10 + $0x1c4] ss:$24 sps:$4 sm:$0xff]  }
 0x1c8   :  { %3706 = vmatprep.subr.bf16.mxu1 %v5927_v41  ;;  %v6006_v38 = vld [vmem:[#allocation13 + $0x1bc] ss:$24 sps:$4 sm:$0xff]  }
 0x1c9   :  { %v6001_v41 = vld [vmem:[#allocation10 + $0x1c0] ss:$24 sps:$4 sm:$0xff]  }
 0x1ca   :  { %2203 = vmatpush1.bf16.msra.mxu0 %v5922_v43  ;;  %v6004_v43 = vld [vmem:[#allocation13 + $0x1b8] ss:$24 sps:$4 sm:$0xff]  }
 0x1cb   :  { %3707 = vmatpush1.bf16.msra.mxu1 %v5925_v44  ;;  %2204 = vmatprep.subr.bf16.mxu0 %v5930_v45  ;;  %v6009_v44 = vld [vmem:[#allocation10 + $0x1f4] ss:$24 sps:$4 sm:$0xff]  }
 0x1cc   :  { %3708 = vmatprep.subr.bf16.mxu1 %v5933_v32  ;;  %v6012_v45 = vld [vmem:[#allocation13 + $0x1ec] ss:$24 sps:$4 sm:$0xff]  }
 0x1cd   :  { %v6007_v32 = vld [vmem:[#allocation10 + $0x1f0] ss:$24 sps:$4 sm:$0xff]  }
 0x1ce   :  { %2205 = vmatpush1.bf16.msra.mxu0 %v5928_v46  ;;  %v6010_v46 = vld [vmem:[#allocation13 + $0x1e8] ss:$24 sps:$4 sm:$0xff]  }
 0x1cf   :  { %3709 = vmatpush1.bf16.msra.mxu1 %v5931_v48  ;;  %2206 = vmatprep.subr.bf16.mxu0 %v5936_v51  ;;  %v6015_v48 = vld [vmem:[#allocation10 + $0x224] ss:$24 sps:$4 sm:$0xff]  }
 0x1d0   :  { %3710 = vmatprep.subr.bf16.mxu1 %v5939_v52  ;;  %v6018_v51 = vld [vmem:[#allocation13 + $0x21c] ss:$24 sps:$4 sm:$0xff]  }
 0x1d1   :  { %v6013_v52 = vld [vmem:[#allocation10 + $0x220] ss:$24 sps:$4 sm:$0xff]  }
 0x1d2   :  { %2207 = vmatpush1.bf16.msra.mxu0 %v5934_v54  ;;  %v6016_v54 = vld [vmem:[#allocation13 + $0x218] ss:$24 sps:$4 sm:$0xff]  }
 0x1d3   :  { %3711 = vmatpush1.bf16.msra.mxu1 %v5937_v55  ;;  %2208 = vmatprep.subr.bf16.mxu0 %v5942_v56  ;;  %v6021_v55 = vld [vmem:[#allocation10 + $0x254] ss:$24 sps:$4 sm:$0xff]  }
 0x1d4   :  { %3712 = vmatprep.subr.bf16.mxu1 %v5945_v34  ;;  %v6024_v56 = vld [vmem:[#allocation13 + $0x24c] ss:$24 sps:$4 sm:$0xff]  }
 0x1d5   :  { %v6019_v34 = vld [vmem:[#allocation10 + $0x250] ss:$24 sps:$4 sm:$0xff]  }
 0x1d6   :  { %2209 = vmatpush1.bf16.msra.mxu0 %v5940_v57  ;;  %v6022_v57 = vld [vmem:[#allocation13 + $0x248] ss:$24 sps:$4 sm:$0xff]  }
 0x1d7   :  { %3713 = vmatpush1.bf16.msra.mxu1 %v5943_v58  ;;  %2301 = vmatprep.subr.bf16.mxu0 %v5949_v59  ;;  %v6027_v58 = vld [vmem:[#allocation10 + $0x284] ss:$24 sps:$4 sm:$0xff]  }
 0x1d8   :  { %3723 = vmatprep.subr.bf16.mxu1 %v5952_v60  ;;  %v6030_v59 = vld [vmem:[#allocation13 + $0x27c] ss:$24 sps:$4 sm:$0xff]  }
 0x1d9   :  { %2211 = vmatmul.mubr.bf16.vlgmr.msra.gmra.mrb[4].mxu0 %v7052_v17  ;;  %v6025_v60 = vld [vmem:[#allocation10 + $0x280] ss:$24 sps:$4 sm:$0xff]  }
 0x1da   :  { %3715 = vmatmul.mubr.bf16.vlgmr.msra.gmra.mrb[4].mxu1 %v7103_v63  ;;  %2302 = vmatpush1.bf16.msra.mxu0 %v5947_v61  ;;  %v6028_v61 = vld [vmem:[#allocation13 + $0x278] ss:$24 sps:$4 sm:$0xff]  }
 0x1db   :  { %3724 = vmatpush1.bf16.msra.mxu1 %v5950_v0  ;;  %2303 = vmatprep.subr.bf16.mxu0 %v5955_v1  ;;  %v6033_v0 = vld [vmem:[#allocation10 + $0x2b4] ss:$24 sps:$4 sm:$0xff]  }
 0x1dc   :  { %3725 = vmatprep.subr.bf16.mxu1 %v5958_v2  ;;  %2333 = vmatprep.mubr.bf16.mxu0 %v7046_v62  ;;  %v5979_v62 = vld [vmem:[#allocation10 + $0x104] ss:$24 sps:$4 sm:$0xff]   ;;  %v6036_v1 = vld [vmem:[#allocation13 + $0x2ac] ss:$24 sps:$4 sm:$0xff]  }
 0x1dd   :  { %3755 = vmatprep.mubr.bf16.mxu1 %v7081_v40  ;;  %v6031_v2 = vld [vmem:[#allocation10 + $0x2b0] ss:$24 sps:$4 sm:$0xff]  }
 0x1de   :  { %2304 = vmatpush1.bf16.msra.mxu0 %v5953_v4  ;;  %v6034_v4 = vld [vmem:[#allocation13 + $0x2a8] ss:$24 sps:$4 sm:$0xff]  }
 0x1df   :  { %3726 = vmatpush1.bf16.msra.mxu1 %v5956_v5  ;;  %2305 = vmatprep.subr.bf16.mxu0 %v5961_v6  ;;  %v6039_v5 = vld [vmem:[#allocation10 + $0x2e4] ss:$24 sps:$4 sm:$0xff]  }
 0x1e0   :  { %3727 = vmatprep.subr.bf16.mxu1 %v5964_v7  ;;  %v6042_v6 = vld [vmem:[#allocation13 + $0x2dc] ss:$24 sps:$4 sm:$0xff]  }
 0x1e1   :  { %v6037_v7 = vld [vmem:[#allocation10 + $0x2e0] ss:$24 sps:$4 sm:$0xff]  }
 0x1e2   :  { %2306 = vmatpush1.bf16.msra.mxu0 %v5959_v39  ;;  %v6040_v39 = vld [vmem:[#allocation13 + $0x2d8] ss:$24 sps:$4 sm:$0xff]  }
 0x1e3   :  { %3728 = vmatpush1.bf16.msra.mxu1 %v5962_v8  ;;  %2307 = vmatprep.subr.bf16.mxu0 %v5967_v9  ;;  %v6045_v8 = vld [vmem:[#allocation10 + $0x314] ss:$24 sps:$4 sm:$0xff]  }
 0x1e4   :  { %3729 = vmatprep.subr.bf16.mxu1 %v5970_v10  ;;  %v6048_v9 = vld [vmem:[#allocation13 + $0x30c] ss:$24 sps:$4 sm:$0xff]  }
 0x1e5   :  { %v6043_v10 = vld [vmem:[#allocation10 + $0x310] ss:$24 sps:$4 sm:$0xff]  }
 0x1e6   :  { %2308 = vmatpush1.bf16.msra.mxu0 %v5965_v11  ;;  %v6046_v11 = vld [vmem:[#allocation13 + $0x308] ss:$24 sps:$4 sm:$0xff]  }
 0x1e7   :  { %3730 = vmatpush1.bf16.msra.mxu1 %v5968_v12  ;;  %2309 = vmatprep.subr.bf16.mxu0 %v5973_v13  ;;  %v6051_v12 = vld [vmem:[#allocation10 + $0x344] ss:$24 sps:$4 sm:$0xff]  }
 0x1e8   :  { %3731 = vmatprep.subr.bf16.mxu1 %v5976_v14  ;;  %v6054_v13 = vld [vmem:[#allocation13 + $0x33c] ss:$24 sps:$4 sm:$0xff]  }
 0x1e9   :  { %v6049_v14 = vld [vmem:[#allocation10 + $0x340] ss:$24 sps:$4 sm:$0xff]  }
 0x1ea   :  { %2310 = vmatpush1.bf16.msra.mxu0 %v5971_v15  ;;  %v6052_v15 = vld [vmem:[#allocation13 + $0x338] ss:$24 sps:$4 sm:$0xff]  }
 0x1eb   :  { %3732 = vmatpush1.bf16.msra.mxu1 %v5974_v16  ;;  %2311 = vmatprep.subr.bf16.mxu0 %v5979_v62  ;;  %v6057_v16 = vld [vmem:[#allocation10 + $0x374] ss:$24 sps:$4 sm:$0xff]  }
 0x1ec   :  { %3733 = vmatprep.subr.bf16.mxu1 %v5982_v19  ;;  %v6060_v62 = vld [vmem:[#allocation13 + $0x36c] ss:$24 sps:$4 sm:$0xff]  }
 0x1ed   :  { %v6055_v19 = vld [vmem:[#allocation10 + $0x370] ss:$24 sps:$4 sm:$0xff]  }
 0x1ee   :  { %2312 = vmatpush1.bf16.msra.mxu0 %v5977_v20  ;;  %v6058_v20 = vld [vmem:[#allocation13 + $0x368] ss:$24 sps:$4 sm:$0xff]  }
 0x1ef   :  { %3734 = vmatpush1.bf16.msra.mxu1 %v5980_v21  ;;  %2313 = vmatprep.subr.bf16.mxu0 %v5985_v22  ;;  %v6066_v21 = vld [vmem:[#allocation13 + $0x39c] ss:$24 sps:$4 sm:$0xff]  }
 0x1f0   :  { %3735 = vmatprep.subr.bf16.mxu1 %v5988_v23  ;;  %v6061_v22 = vld [vmem:[#allocation10 + $0x3a0] ss:$24 sps:$4 sm:$0xff]  }
 0x1f1   :  { %v6064_v23 = vld [vmem:[#allocation13 + $0x398] ss:$24 sps:$4 sm:$0xff]  }
 0x1f2   :  { %2314 = vmatpush1.bf16.msra.mxu0 %v5983_v24  ;;  %v6069_v24 = vld [vmem:[#allocation10 + $0x3d4] ss:$24 sps:$4 sm:$0xff]  }
 0x1f3   :  { %3736 = vmatpush1.bf16.msra.mxu1 %v5986_v25  ;;  %2315 = vmatprep.subr.bf16.mxu0 %v5991_v26  ;;  %v6072_v25 = vld [vmem:[#allocation13 + $0x3cc] ss:$24 sps:$4 sm:$0xff]  }
 0x1f4   :  { %3737 = vmatprep.subr.bf16.mxu1 %v5994_v28  ;;  %v6067_v26 = vld [vmem:[#allocation10 + $0x3d0] ss:$24 sps:$4 sm:$0xff]   ;;  %v6075_v28 = vld [vmem:[#allocation10 + $0x404] ss:$24 sps:$4 sm:$0xff]  }
 0x1f6   :  { %2316 = vmatpush1.bf16.msra.mxu0 %v5989_v29  ;;  %v6078_v29 = vld [vmem:[#allocation13 + $0x3fc] ss:$24 sps:$4 sm:$0xff]  }
 0x1f7   :  { %3738 = vmatpush1.bf16.msra.mxu1 %v5992_v30  ;;  %2317 = vmatprep.subr.bf16.mxu0 %v5997_v31  ;;  %v6073_v30 = vld [vmem:[#allocation10 + $0x400] ss:$24 sps:$4 sm:$0xff]  }
 0x1f8   :  { %3739 = vmatprep.subr.bf16.mxu1 %v6000_v33  ;;  %v6076_v31 = vld [vmem:[#allocation13 + $0x3f8] ss:$24 sps:$4 sm:$0xff]  }
 0x1f9   :  { %v6081_v33 = vld [vmem:[#allocation10 + $0x434] ss:$24 sps:$4 sm:$0xff]  }
 0x1fa   :  { %2318 = vmatpush1.bf16.msra.mxu0 %v5995_v35  ;;  %v6084_v35 = vld [vmem:[#allocation13 + $0x42c] ss:$24 sps:$4 sm:$0xff]  }
 0x1fb   :  { %3740 = vmatpush1.bf16.msra.mxu1 %v5998_v36  ;;  %2319 = vmatprep.subr.bf16.mxu0 %v6003_v37  ;;  %v6079_v36 = vld [vmem:[#allocation10 + $0x430] ss:$24 sps:$4 sm:$0xff]  }
 0x1fc   :  { %3741 = vmatprep.subr.bf16.mxu1 %v6006_v38  ;;  %v6082_v37 = vld [vmem:[#allocation13 + $0x428] ss:$24 sps:$4 sm:$0xff]  }
 0x1fe   :  { %2320 = vmatpush1.bf16.msra.mxu0 %v6001_v41 }
 0x1ff   :  { %3742 = vmatpush1.bf16.msra.mxu1 %v6004_v43  ;;  %2321 = vmatprep.subr.bf16.mxu0 %v6009_v44  ;;  %v6087_v44 = vld [vmem:[#allocation10 + $0x464] ss:$24 sps:$4 sm:$0xff]  }
 0x200   :  { %3743 = vmatprep.subr.bf16.mxu1 %v6012_v45  ;;  %v6090_v45 = vld [vmem:[#allocation13 + $0x45c] ss:$24 sps:$4 sm:$0xff]  }
 0x202   :  { %2322 = vmatpush1.bf16.msra.mxu0 %v6007_v32 }
 0x203   :  { %3744 = vmatpush1.bf16.msra.mxu1 %v6010_v46  ;;  %2323 = vmatprep.subr.bf16.mxu0 %v6015_v48  ;;  %v6085_v46 = vld [vmem:[#allocation10 + $0x460] ss:$24 sps:$4 sm:$0xff]  }
 0x204   :  { %3745 = vmatprep.subr.bf16.mxu1 %v6018_v51  ;;  %v6088_v48 = vld [vmem:[#allocation13 + $0x458] ss:$24 sps:$4 sm:$0xff]  }
 0x205   :  { %v7117_v51 = vld [vmem:[#allocation2] sm:$0x3f] }
 0x206   :  { %2324 = vmatpush1.bf16.msra.mxu0 %v6013_v52  ;;  %v7120_v52 = vsub.s32 0, %v7039_v42 }
 0x207   :  { %3746 = vmatpush1.bf16.msra.mxu1 %v6016_v54  ;;  %2325 = vmatprep.subr.bf16.mxu0 %v6021_v55  ;;  %v7123_v54 = vsub.s32 1, %v7039_v42  ;;  %v6093_v55 = vld [vmem:[#allocation10 + $0x494] ss:$24 sps:$4 sm:$0xff]  }
 0x208   :  { %3747 = vmatprep.subr.bf16.mxu1 %v6024_v56  ;;  %v6096_v56 = vld [vmem:[#allocation13 + $0x48c] ss:$24 sps:$4 sm:$0xff]  }
 0x20a   :  { %2326 = vmatpush1.bf16.msra.mxu0 %v6019_v34  ;;  %v6091_v34 = vld [vmem:[#allocation10 + $0x490] ss:$24 sps:$4 sm:$0xff]  }
 0x20b   :  { %3748 = vmatpush1.bf16.msra.mxu1 %v6022_v57  ;;  %2327 = vmatprep.subr.bf16.mxu0 %v6027_v58  ;;  %v6094_v57 = vld [vmem:[#allocation13 + $0x488] ss:$24 sps:$4 sm:$0xff]   ;;  %v202_v58 = vrot.slane %v7117_v51, %v7120_v52 }
 0x20c   :  { %3749 = vmatprep.subr.bf16.mxu1 %v6030_v59  ;;  %v206_v59 = vrot.slane %v7117_v51, %v7123_v54 }
 0x20e   :  { %2328 = vmatpush1.bf16.msra.mxu0 %v6025_v60  ;;  %v7130_v60 = vsub.s32 2, %v7039_v42 }
 0x20f   :  { %3750 = vmatpush1.bf16.msra.mxu1 %v6028_v61  ;;  %2329 = vmatprep.subr.bf16.mxu0 %v6033_v0  ;;  %v6099_v61 = vld [vmem:[#allocation10 + $0x4c4] ss:$24 sps:$4 sm:$0xff]  }
 0x210   :  { %3751 = vmatprep.subr.bf16.mxu1 %v6036_v1  ;;  %v6102_v0 = vld [vmem:[#allocation13 + $0x4bc] ss:$24 sps:$4 sm:$0xff]   ;;  %v223_v1 = vcombine.low %v202_v58, %v206_v59  ;;  %v6145_v59 = vld [vmem:[#allocation10 + $0x670] ss:$24 sps:$4 sm:$0xff]  }
 0x211   :  { %v6195_v58 = vld [vmem:[#allocation16 + $0x24] ss:$8 sps:$4 sm:$0xff]  }
 0x212   :  { %2330 = vmatpush1.bf16.msra.mxu0 %v6031_v2  ;;  %v210_v2 = vrot.slane %v7117_v51, %v7130_v60 }
 0x213   :  { %3752 = vmatpush1.bf16.msra.mxu1 %v6034_v4  ;;  %2331 = vmatprep.subr.bf16.mxu0 %v6039_v5  ;;  %v7135_v4 = vsub.s32 3, %v7039_v42  ;;  %v6097_v5 = vld [vmem:[#allocation10 + $0x4c0] ss:$24 sps:$4 sm:$0xff]  }
 0x214   :  { %3753 = vmatprep.subr.bf16.mxu1 %v6042_v6  ;;  %v6100_v6 = vld [vmem:[#allocation13 + $0x4b8] ss:$24 sps:$4 sm:$0xff]  }
 0x216   :  { %2332 = vmatpush1.bf16.msra.mxu0 %v6037_v7  ;;  %v214_v7 = vrot.slane %v7117_v51, %v7135_v4 }
 0x217   :  { %3754 = vmatpush1.bf16.msra.mxu1 %v6040_v39  ;;  %2342 = vmatprep.subr.bf16.mxu0 %v6045_v8  ;;  %v6105_v39 = vld [vmem:[#allocation10 + $0x4f4] ss:$24 sps:$4 sm:$0xff]  }
 0x218   :  { %3764 = vmatprep.subr.bf16.mxu1 %v6048_v9  ;;  %v6108_v8 = vld [vmem:[#allocation13 + $0x4ec] ss:$24 sps:$4 sm:$0xff]  }
 0x219   :  { %2334 = vmatmul.mubr.bf16.vlgmr.msra.gmra.mrb[8].mxu0 %v7052_v17  ;;  %v6063_v17 = vld [vmem:[#allocation10 + $0x3a4] ss:$24 sps:$4 sm:$0xff]   ;;  %v6103_v9 = vld [vmem:[#allocation10 + $0x4f0] ss:$24 sps:$4 sm:$0xff]  }
 0x21a   :  { %3756 = vmatmul.mubr.bf16.vlgmr.msra.gmra.mrb[8].mxu1 %v7093_v47  ;;  %2343 = vmatpush1.bf16.msra.mxu0 %v6043_v10  ;;  %v224_v10 = vcombine.low %v210_v2, %v214_v7  ;;  %v6199_v2 = vld [vmem:[#allocation16 + $0x30] ss:$8 sps:$4 sm:$0xff]   ;;  %v6151_v7 = vld [vmem:[#allocation10 + $0x6d0] ss:$24 sps:$4 sm:$0xff]  }
 0x21b   :  { %3765 = vmatpush1.bf16.msra.mxu1 %v6046_v11  ;;  %2344 = vmatprep.subr.bf16.mxu0 %v6051_v12  ;;  %v231_v11 = vrot.slane %v223_v1, %v7042_v49  ;;  %v6106_v12 = vld [vmem:[#allocation13 + $0x4e8] ss:$24 sps:$4 sm:$0xff]  }
 0x21c   :  { %3766 = vmatprep.subr.bf16.mxu1 %v6054_v13  ;;  %3796 = vmatprep.mubr.bf16.mxu1 %v7095_v53  ;;  %v6111_v13 = vld [vmem:[#allocation10 + $0x524] ss:$24 sps:$4 sm:$0xff]   ;;  %v6201_v1 = vld [vmem:[#allocation16 + $0x34] ss:$8 sps:$4 sm:$0xff]  }
 0x21d   :  { %2374 = vmatprep.mubr.bf16.mxu0 %v7048_v3  ;;  %v6070_v3 = vld [vmem:[#allocation13 + $0x3c8] ss:$24 sps:$4 sm:$0xff]  }
 0x21e   :  { %2345 = vmatpush1.bf16.msra.mxu0 %v6049_v14  ;;  %v238_v14 = vrot.slane %v224_v10, %v7042_v49  ;;  %v6211_v10 = vld [vmem:[#allocation16 + $0x50] ss:$8 sps:$4 sm:$0xff]  }
 0x21f   :  { %3767 = vmatpush1.bf16.msra.mxu1 %v6052_v15  ;;  %2346 = vmatprep.subr.bf16.mxu0 %v6057_v16  ;;  %v6114_v15 = vld [vmem:[#allocation13 + $0x51c] ss:$24 sps:$4 sm:$0xff]  }
 0x220   :  { %3768 = vmatprep.subr.bf16.mxu1 %v6060_v62  ;;  %v195_v16 = vld [vmem:[%s7235_s0] sm:$0xff]  ;;  %v239_v62 = vcombine.low %v231_v11, %v238_v14  ;;  %v6159_v11 = vld [vmem:[#allocation10 + $0x734] ss:$24 sps:$4 sm:$0xff]  }
 0x222   :  { %2347 = vmatpush1.bf16.msra.mxu0 %v6055_v19  ;;  %v6109_v19 = vld [vmem:[#allocation10 + $0x520] ss:$24 sps:$4 sm:$0xff]  }
 0x223   :  { %3769 = vmatpush1.bf16.msra.mxu1 %v6058_v20  ;;  %2348 = vmatprep.subr.bf16.mxu0 %v6063_v17  ;;  %v6112_v20 = vld [vmem:[#allocation13 + $0x518] ss:$24 sps:$4 sm:$0xff]   ;;  %v250_v17 = vmul.f32 %v239_v62, %v195_v16  ;;  %v6157_v16 = vld [vmem:[#allocation10 + $0x730] ss:$24 sps:$4 sm:$0xff]  }
 0x224   :  { %3770 = vmatprep.subr.bf16.mxu1 %v6066_v21  ;;  %v6117_v21 = vld [vmem:[#allocation10 + $0x554] ss:$24 sps:$4 sm:$0xff]  }
 0x225   :  { %252 = vst [vmem:[%s7248_s13] sm:$0xff] %v250_v17  ;;  %v6217_v62 = vld [vmem:[#allocation16 + $0x60] ss:$8 sps:$4 sm:$0xff]   ;;  %v6225_v17 = vld [vmem:[#allocation16 + $0x74] ss:$8 sps:$4 sm:$0xff]  }
 0x226   :  { %2349 = vmatpush1.bf16.msra.mxu0 %v6061_v22  ;;  %v6120_v22 = vld [vmem:[#allocation13 + $0x54c] ss:$24 sps:$4 sm:$0xff]  }
 0x227   :  { %3771 = vmatpush1.bf16.msra.mxu1 %v6064_v23  ;;  %2350 = vmatprep.subr.bf16.mxu0 %v6069_v24  ;;  %v6115_v23 = vld [vmem:[#allocation10 + $0x550] ss:$24 sps:$4 sm:$0xff]  }
 0x228   :  { %3772 = vmatprep.subr.bf16.mxu1 %v6072_v25  ;;  %v6118_v24 = vld [vmem:[#allocation13 + $0x548] ss:$24 sps:$4 sm:$0xff]  }
 0x229   :  { %v6123_v25 = vld [vmem:[#allocation10 + $0x584] ss:$24 sps:$4 sm:$0xff]  }
 0x22a   :  { %2351 = vmatpush1.bf16.msra.mxu0 %v6067_v26  ;;  %v6126_v26 = vld [vmem:[#allocation13 + $0x57c] ss:$24 sps:$4 sm:$0xff]  }
 0x22b   :  { %3773 = vmatpush1.bf16.msra.mxu1 %v6070_v3  ;;  %2352 = vmatprep.subr.bf16.mxu0 %v6075_v28  ;;  %v6121_v3 = vld [vmem:[#allocation10 + $0x580] ss:$24 sps:$4 sm:$0xff]  }
 0x22c   :  { %3774 = vmatprep.subr.bf16.mxu1 %v6078_v29  ;;  %v6124_v28 = vld [vmem:[#allocation13 + $0x578] ss:$24 sps:$4 sm:$0xff]  }
 0x22d   :  { %v7113_v38 = vpop.f32.mrb[0].mxu1  ;;  %v6129_v29 = vld [vmem:[#allocation10 + $0x5b4] ss:$24 sps:$4 sm:$0xff]  }
 0x22e   :  { %v7115_v41 = vpop.f32.mrb[1].mxu1  ;;  %2353 = vmatpush1.bf16.msra.mxu0 %v6073_v30  ;;  %v6132_v30 = vld [vmem:[#allocation13 + $0x5ac] ss:$24 sps:$4 sm:$0xff]  }
 0x22f   :  { %3775 = vmatpush1.bf16.msra.mxu1 %v6076_v31  ;;  %v2298_v43 = vpop.f32.mrb[2].mxu1  ;;  %2354 = vmatprep.subr.bf16.mxu0 %v6081_v33  ;;  %v6127_v31 = vld [vmem:[#allocation10 + $0x5b0] ss:$24 sps:$4 sm:$0xff]  }
 0x230   :  { %3776 = vmatprep.subr.bf16.mxu1 %v6084_v35  ;;  %v2299_v32 = vpop.f32.mrb[3].mxu1  ;;  %v6130_v33 = vld [vmem:[#allocation13 + $0x5a8] ss:$24 sps:$4 sm:$0xff]   ;;  %v6136_v43 = vld [vmem:[#allocation13 + $0x5d8] ss:$24 sps:$4 sm:$0xff]  }
 0x231   :  { %v6135_v35 = vld [vmem:[#allocation10 + $0x5e4] ss:$24 sps:$4 sm:$0xff]   ;;  %v6139_v32 = vld [vmem:[#allocation10 + $0x610] ss:$24 sps:$4 sm:$0xff]  }
 0x232   :  { %2355 = vmatpush1.bf16.msra.mxu0 %v6079_v36  ;;  %v6138_v36 = vld [vmem:[#allocation13 + $0x5dc] ss:$24 sps:$4 sm:$0xff]  }
 0x233   :  { %3777 = vmatpush1.bf16.msra.mxu1 %v6082_v37  ;;  %2356 = vmatprep.subr.bf16.mxu0 %v6087_v44  ;;  %v6133_v37 = vld [vmem:[#allocation10 + $0x5e0] ss:$24 sps:$4 sm:$0xff]   ;;  %v6141_v44 = vld [vmem:[#allocation10 + $0x614] ss:$24 sps:$4 sm:$0xff]  }
 0x234   :  { %3778 = vmatprep.subr.bf16.mxu1 %v6090_v45  ;;  %v6183_v45 = vld [vmem:[#allocation16 + $0x4] ss:$8 sps:$4 sm:$0xff]  }
 0x236   :  { %2357 = vmatpush1.bf16.msra.mxu0 %v6085_v46  ;;  %v6181_v46 = vld [vmem:[#allocation16] ss:$8 sps:$4 sm:$0xff]  }
 0x237   :  { %3779 = vmatpush1.bf16.msra.mxu1 %v6088_v48  ;;  %2358 = vmatprep.subr.bf16.mxu0 %v6093_v55  ;;  %v6144_v48 = vld [vmem:[#allocation10 + $0x644] ss:$24 sps:$4 sm:$0xff]   ;;  %v6189_v55 = vld [vmem:[#allocation16 + $0x14] ss:$8 sps:$4 sm:$0xff]  }
 0x238   :  { %3780 = vmatprep.subr.bf16.mxu1 %v6096_v56  ;;  %v6142_v56 = vld [vmem:[#allocation10 + $0x640] ss:$24 sps:$4 sm:$0xff]  }
 0x23a   :  { %2359 = vmatpush1.bf16.msra.mxu0 %v6091_v34  ;;  %v6187_v34 = vld [vmem:[#allocation16 + $0x10] ss:$8 sps:$4 sm:$0xff]  }
 0x23b   :  { %3781 = vmatpush1.bf16.msra.mxu1 %v6094_v57  ;;  %2360 = vmatprep.subr.bf16.mxu0 %v6099_v61  ;;  %v6147_v57 = vld [vmem:[#allocation10 + $0x674] ss:$24 sps:$4 sm:$0xff]  }
 0x23c   :  { %3782 = vmatprep.subr.bf16.mxu1 %v6102_v0  ;;  %v6193_v61 = vld [vmem:[#allocation16 + $0x20] ss:$8 sps:$4 sm:$0xff]   ;;  %v6150_v0 = vld [vmem:[#allocation10 + $0x6a4] ss:$24 sps:$4 sm:$0xff]  }
 0x23e   :  { %2361 = vmatpush1.bf16.msra.mxu0 %v6097_v5  ;;  %v6153_v5 = vld [vmem:[#allocation10 + $0x6d4] ss:$24 sps:$4 sm:$0xff]  }
 0x23f   :  { %3783 = vmatpush1.bf16.msra.mxu1 %v6100_v6  ;;  %2362 = vmatprep.subr.bf16.mxu0 %v6105_v39  ;;  %v6207_v6 = vld [vmem:[#allocation16 + $0x44] ss:$8 sps:$4 sm:$0xff]   ;;  %v6156_v39 = vld [vmem:[#allocation10 + $0x704] ss:$24 sps:$4 sm:$0xff]  }
 0x240   :  { %3784 = vmatprep.subr.bf16.mxu1 %v6108_v8  ;;  %v6213_v8 = vld [vmem:[#allocation16 + $0x54] ss:$8 sps:$4 sm:$0xff]  }
 0x242   :  { %2363 = vmatpush1.bf16.msra.mxu0 %v6103_v9  ;;  %v6154_v9 = vld [vmem:[#allocation10 + $0x700] ss:$24 sps:$4 sm:$0xff]  }
 0x243   :  { %3785 = vmatpush1.bf16.msra.mxu1 %v6106_v12  ;;  %2364 = vmatprep.subr.bf16.mxu0 %v6111_v13  ;;  %v6219_v12 = vld [vmem:[#allocation16 + $0x64] ss:$8 sps:$4 sm:$0xff]  }
 0x244   :  { %3786 = vmatprep.subr.bf16.mxu1 %v6114_v15 }
 0x246   :  { %2365 = vmatpush1.bf16.msra.mxu0 %v6109_v19 }
 0x247   :  { %3787 = vmatpush1.bf16.msra.mxu1 %v6112_v20  ;;  %2366 = vmatprep.subr.bf16.mxu0 %v6117_v21  ;;  %v6162_v20 = vld [vmem:[#allocation10 + $0x764] ss:$24 sps:$4 sm:$0xff]   ;;  %v6160_v21 = vld [vmem:[#allocation10 + $0x760] ss:$24 sps:$4 sm:$0xff]  }
 0x248   :  { %3788 = vmatprep.subr.bf16.mxu1 %v6120_v22  ;;  %v6223_v22 = vld [vmem:[#allocation16 + $0x70] ss:$8 sps:$4 sm:$0xff]  }
 0x24a   :  { %2367 = vmatpush1.bf16.msra.mxu0 %v6115_v23  ;;  %v6165_v23 = vld [vmem:[#allocation10 + $0x794] ss:$24 sps:$4 sm:$0xff]  }
 0x24b   :  { %3789 = vmatpush1.bf16.msra.mxu1 %v6118_v24  ;;  %2368 = vmatprep.subr.bf16.mxu0 %v6123_v25  ;;  %v6231_v24 = vld [vmem:[#allocation16 + $0x84] ss:$8 sps:$4 sm:$0xff]  }
 0x24c   :  { %3790 = vmatprep.subr.bf16.mxu1 %v6126_v26  ;;  %v6163_v25 = vld [vmem:[#allocation10 + $0x790] ss:$24 sps:$4 sm:$0xff]   ;;  %v6229_v26 = vld [vmem:[#allocation16 + $0x80] ss:$8 sps:$4 sm:$0xff]  }
 0x24e   :  { %2369 = vmatpush1.bf16.msra.mxu0 %v6121_v3  ;;  %v6168_v3 = vld [vmem:[#allocation10 + $0x7c4] ss:$24 sps:$4 sm:$0xff]  }
 0x24f   :  { %3791 = vmatpush1.bf16.msra.mxu1 %v6124_v28  ;;  %2370 = vmatprep.subr.bf16.mxu0 %v6129_v29  ;;  %v6237_v28 = vld [vmem:[#allocation16 + $0x94] ss:$8 sps:$4 sm:$0xff]  }
 0x250   :  { %3792 = vmatprep.subr.bf16.mxu1 %v6132_v30  ;;  %v6166_v29 = vld [vmem:[#allocation10 + $0x7c0] ss:$24 sps:$4 sm:$0xff]   ;;  %v6235_v30 = vld [vmem:[#allocation16 + $0x90] ss:$8 sps:$4 sm:$0xff]  }
 0x252   :  { %2371 = vmatpush1.bf16.msra.mxu0 %v6127_v31  ;;  %v6171_v31 = vld [vmem:[#allocation10 + $0x7f4] ss:$24 sps:$4 sm:$0xff]  }
 0x253   :  { %3793 = vmatpush1.bf16.msra.mxu1 %v6130_v33  ;;  %2372 = vmatprep.subr.bf16.mxu0 %v6135_v35  ;;  %v6243_v33 = vld [vmem:[#allocation16 + $0xa4] ss:$8 sps:$4 sm:$0xff]  }
 0x254   :  { %3794 = vmatprep.subr.bf16.mxu1 %v6138_v36  ;;  %v6169_v35 = vld [vmem:[#allocation10 + $0x7f0] ss:$24 sps:$4 sm:$0xff]   ;;  %v6241_v36 = vld [vmem:[#allocation16 + $0xa0] ss:$8 sps:$4 sm:$0xff]  }
 0x256   :  { %2373 = vmatpush1.bf16.msra.mxu0 %v6133_v37  ;;  %v6174_v37 = vld [vmem:[#allocation10 + $0x824] ss:$24 sps:$4 sm:$0xff]  }
 0x257   :  { %3795 = vmatpush1.bf16.msra.mxu1 %v6136_v43  ;;  %2383 = vmatprep.subr.bf16.mxu0 %v6141_v44  ;;  %v6249_v43 = vld [vmem:[#allocation16 + $0xb4] ss:$8 sps:$4 sm:$0xff]  }
 0x258   :  { %4540 = vmatprep.subr.bf16.mxu1 %v6183_v45  ;;  %v6172_v44 = vld [vmem:[#allocation10 + $0x820] ss:$24 sps:$4 sm:$0xff]   ;;  %v6247_v45 = vld [vmem:[#allocation16 + $0xb0] ss:$8 sps:$4 sm:$0xff]  }
 0x259   :  { %2375 = vmatmul.mubr.bf16.vlgmr.msra.gmra.mrb[8].mxu0 %v7054_v18  ;;  %v6148_v18 = vld [vmem:[#allocation10 + $0x6a0] ss:$24 sps:$4 sm:$0xff]  }
 0x25a   :  { %3797 = vmatmul.mubr.bf16.vlgmr.msra.gmra.mrb[8].mxu1 %v7103_v63  ;;  %2384 = vmatpush1.bf16.msra.mxu0 %v6139_v32  ;;  %v6177_v32 = vld [vmem:[#allocation10 + $0x854] ss:$24 sps:$4 sm:$0xff]  }
 0x25b   :  { %4541 = vmatpush1.bf16.msra.mxu1 %v6181_v46  ;;  %2385 = vmatprep.subr.bf16.mxu0 %v6144_v48  ;;  %v6255_v46 = vld [vmem:[#allocation16 + $0xc4] ss:$8 sps:$4 sm:$0xff]  }
 0x25c   :  { %4542 = vmatprep.subr.bf16.mxu1 %v6189_v55  ;;  %2415 = vmatprep.mubr.bf16.mxu0 %v7063_v50  ;;  %v6205_v50 = vld [vmem:[#allocation16 + $0x40] ss:$8 sps:$4 sm:$0xff]   ;;  %v6175_v48 = vld [vmem:[#allocation10 + $0x850] ss:$24 sps:$4 sm:$0xff]  }
 0x25d   :  { %v6253_v55 = vld [vmem:[#allocation16 + $0xc0] ss:$8 sps:$4 sm:$0xff]  }
 0x25e   :  { %2386 = vmatpush1.bf16.msra.mxu0 %v6142_v56  ;;  %v6180_v56 = vld [vmem:[#allocation10 + $0x884] ss:$24 sps:$4 sm:$0xff]  }
 0x25f   :  { %4543 = vmatpush1.bf16.msra.mxu1 %v6187_v34  ;;  %2387 = vmatprep.subr.bf16.mxu0 %v6147_v57  ;;  %v6261_v34 = vld [vmem:[#allocation16 + $0xd4] ss:$8 sps:$4 sm:$0xff]  }
 0x260   :  { %4544 = vmatprep.subr.bf16.mxu1 %v6195_v58  ;;  %v6178_v57 = vld [vmem:[#allocation10 + $0x880] ss:$24 sps:$4 sm:$0xff]   ;;  %v6259_v58 = vld [vmem:[#allocation16 + $0xd0] ss:$8 sps:$4 sm:$0xff]  }
 0x262   :  { %2388 = vmatpush1.bf16.msra.mxu0 %v6145_v59  ;;  %v6186_v59 = vld [vmem:[#allocation10 + $0x8b4] ss:$24 sps:$4 sm:$0xff]  }
 0x263   :  { %4545 = vmatpush1.bf16.msra.mxu1 %v6193_v61  ;;  %2389 = vmatprep.subr.bf16.mxu0 %v6150_v0  ;;  %v6267_v61 = vld [vmem:[#allocation16 + $0xe4] ss:$8 sps:$4 sm:$0xff]  }
 0x264   :  { %4546 = vmatprep.subr.bf16.mxu1 %v6201_v1  ;;  %v6184_v0 = vld [vmem:[#allocation10 + $0x8b0] ss:$24 sps:$4 sm:$0xff]   ;;  %v6265_v1 = vld [vmem:[#allocation16 + $0xe0] ss:$8 sps:$4 sm:$0xff]  }
 0x266   :  { %2390 = vmatpush1.bf16.msra.mxu0 %v6148_v18  ;;  %v6192_v18 = vld [vmem:[#allocation10 + $0x8e4] ss:$24 sps:$4 sm:$0xff]  }
 0x267   :  { %4547 = vmatpush1.bf16.msra.mxu1 %v6199_v2  ;;  %2391 = vmatprep.subr.bf16.mxu0 %v6153_v5  ;;  %v6273_v2 = vld [vmem:[#allocation16 + $0xf4] ss:$8 sps:$4 sm:$0xff]  }
 0x268   :  { %4548 = vmatprep.subr.bf16.mxu1 %v6207_v6  ;;  %v6190_v5 = vld [vmem:[#allocation10 + $0x8e0] ss:$24 sps:$4 sm:$0xff]   ;;  %v6271_v6 = vld [vmem:[#allocation16 + $0xf0] ss:$8 sps:$4 sm:$0xff]  }
 0x26a   :  { %2392 = vmatpush1.bf16.msra.mxu0 %v6151_v7  ;;  %v6198_v7 = vld [vmem:[#allocation13 + $0x14] ss:$24 sps:$4 sm:$0xff]  }
 0x26b   :  { %4549 = vmatpush1.bf16.msra.mxu1 %v6205_v50  ;;  %2393 = vmatprep.subr.bf16.mxu0 %v6156_v39  ;;  %v6327_v50 = vld [vmem:[#allocation16 + $0x104] ss:$8 sps:$4 sm:$0xff]  }
 0x26c   :  { %4550 = vmatprep.subr.bf16.mxu1 %v6213_v8  ;;  %v7150_v13 = vpop.f32.mrb[0].mxu0  ;;  %v6196_v39 = vld [vmem:[#allocation13 + $0x10] ss:$24 sps:$4 sm:$0xff]   ;;  %v6204_v8 = vld [vmem:[#allocation13 + $0x44] ss:$24 sps:$4 sm:$0xff]  }
 0x26d   :  { %v7152_v14 = vpop.f32.mrb[1].mxu0 }
 0x26e   :  { %v2175_v15 = vpop.f32.mrb[2].mxu0  ;;  %2394 = vmatpush1.bf16.msra.mxu0 %v6154_v9  ;;  %v6202_v9 = vld [vmem:[#allocation13 + $0x40] ss:$24 sps:$4 sm:$0xff]  }
 0x26f   :  { %4551 = vmatpush1.bf16.msra.mxu1 %v6211_v10  ;;  %v2176_v19 = vpop.f32.mrb[3].mxu0  ;;  %2395 = vmatprep.subr.bf16.mxu0 %v6159_v11  ;;  %v6210_v10 = vld [vmem:[#allocation13 + $0x74] ss:$24 sps:$4 sm:$0xff]   ;;  %v6208_v11 = vld [vmem:[#allocation13 + $0x70] ss:$24 sps:$4 sm:$0xff]  }
 0x270   :  { %4552 = vmatprep.subr.bf16.mxu1 %v6219_v12  ;;  %v6216_v12 = vld [vmem:[#allocation13 + $0xa4] ss:$24 sps:$4 sm:$0xff]   ;;  %v6214_v15 = vld [vmem:[#allocation13 + $0xa0] ss:$24 sps:$4 sm:$0xff]   ;;  %v6220_v19 = vld [vmem:[#allocation13 + $0xd0] ss:$24 sps:$4 sm:$0xff]  }
 0x272   :  { %2396 = vmatpush1.bf16.msra.mxu0 %v6157_v16  ;;  %v6222_v16 = vld [vmem:[#allocation13 + $0xd4] ss:$24 sps:$4 sm:$0xff]  }
 0x273   :  { %4553 = vmatpush1.bf16.msra.mxu1 %v6217_v62  ;;  %2397 = vmatprep.subr.bf16.mxu0 %v6162_v20  ;;  %v7156_v62 = vld [vmem:[#allocation11] sm:$0x3f]  ;;  %v7158_v20 = vld [vmem:[#allocation14] sm:$0x3f] }
 0x274   :  { %4554 = vmatprep.subr.bf16.mxu1 %v6225_v17  ;;  %v596_v17 = vrot.slane %v7156_v62, %v7130_v60 }
 0x276   :  { %2398 = vmatpush1.bf16.msra.mxu0 %v6160_v21  ;;  %v2654_v21 = vrot.slane %v7158_v20, %v7120_v52 }
 0x277   :  { %4555 = vmatpush1.bf16.msra.mxu1 %v6223_v22  ;;  %2399 = vmatprep.subr.bf16.mxu0 %v6165_v23  ;;  %v592_v22 = vrot.slane %v7156_v62, %v7123_v54  ;;  %v600_v23 = vrot.slane %v7156_v62, %v7135_v4 }
 0x278   :  { %4556 = vmatprep.subr.bf16.mxu1 %v6231_v24  ;;  %v2658_v24 = vrot.slane %v7158_v20, %v7123_v54 }
 0x27a   :  { %2400 = vmatpush1.bf16.msra.mxu0 %v6163_v25  ;;  %v6226_v25 = vld [vmem:[#allocation13 + $0x100] ss:$24 sps:$4 sm:$0xff]  }
 0x27b   :  { %4557 = vmatpush1.bf16.msra.mxu1 %v6229_v26  ;;  %2401 = vmatprep.subr.bf16.mxu0 %v6168_v3  ;;  %v6234_v26 = vld [vmem:[#allocation13 + $0x134] ss:$24 sps:$4 sm:$0xff]  }
 0x27c   :  { %4558 = vmatprep.subr.bf16.mxu1 %v6237_v28 }
 0x27e   :  { %2402 = vmatpush1.bf16.msra.mxu0 %v6166_v29 }
 0x27f   :  { %4559 = vmatpush1.bf16.msra.mxu1 %v6235_v30  ;;  %2403 = vmatprep.subr.bf16.mxu0 %v6171_v31 }
 0x280   :  { %4560 = vmatprep.subr.bf16.mxu1 %v6243_v33 }
 0x282   :  { %2404 = vmatpush1.bf16.msra.mxu0 %v6169_v35 }
 0x283   :  { %4561 = vmatpush1.bf16.msra.mxu1 %v6241_v36  ;;  %2405 = vmatprep.subr.bf16.mxu0 %v6174_v37  ;;  %v5486_v36 = vadd.f32 %v7152_v14, %v592_v22  ;;  %v6238_v14 = vld [vmem:[#allocation13 + $0x160] ss:$24 sps:$4 sm:$0xff]   ;;  %v6279_v22 = vld [vmem:[#allocation13 + $0x2b4] ss:$24 sps:$4 sm:$0xff]  }
 0x284   :  { %4562 = vmatprep.subr.bf16.mxu1 %v6249_v43 }
 0x286   :  { %2406 = vmatpush1.bf16.msra.mxu0 %v6172_v44 }
 0x287   :  { %4563 = vmatpush1.bf16.msra.mxu1 %v6247_v45  ;;  %2407 = vmatprep.subr.bf16.mxu0 %v6177_v32  ;;  %v6232_v45 = vld [vmem:[#allocation13 + $0x130] ss:$24 sps:$4 sm:$0xff]  }
 0x288   :  { %4564 = vmatprep.subr.bf16.mxu1 %v6255_v46 }
 0x28a   :  { %2408 = vmatpush1.bf16.msra.mxu0 %v6175_v48 }
 0x28b   :  { %4565 = vmatpush1.bf16.msra.mxu1 %v6253_v55  ;;  %2409 = vmatprep.subr.bf16.mxu0 %v6180_v56  ;;  %v6240_v55 = vld [vmem:[#allocation13 + $0x164] ss:$24 sps:$4 sm:$0xff]   ;;  %v7177_v56 = vld [vmem:[#allocation8] sm:$0xff] }
 0x28c   :  { %4566 = vmatprep.subr.bf16.mxu1 %v6261_v34 }
 0x28e   :  { %2410 = vmatpush1.bf16.msra.mxu0 %v6178_v57  ;;  %v3904_v57 = vrot.slane %v7177_v56, %v7042_v49 }
 0x28f   :  { %4567 = vmatpush1.bf16.msra.mxu1 %v6259_v58  ;;  %2411 = vmatprep.subr.bf16.mxu0 %v6186_v59  ;;  %v6244_v58 = vld [vmem:[#allocation13 + $0x190] ss:$24 sps:$4 sm:$0xff]   ;;  %v6252_v59 = vld [vmem:[#allocation13 + $0x1c4] ss:$24 sps:$4 sm:$0xff]  }
 0x290   :  { %4568 = vmatprep.subr.bf16.mxu1 %v6267_v61  ;;  %v3912_v61 = vcombine.high %v3904_v57, %v3904_v57 }
 0x292   :  { %2412 = vmatpush1.bf16.msra.mxu0 %v6184_v0 }
 0x293   :  { %4569 = vmatpush1.bf16.msra.mxu1 %v6265_v1  ;;  %2413 = vmatprep.subr.bf16.mxu0 %v6192_v18 }
 0x294   :  { %4570 = vmatprep.subr.bf16.mxu1 %v6273_v2 }
 0x296   :  { %2414 = vmatpush1.bf16.msra.mxu0 %v6190_v5  ;;  %v6258_v5 = vld [vmem:[#allocation13 + $0x1f4] ss:$24 sps:$4 sm:$0xff]  }
 0x297   :  { %4571 = vmatpush1.bf16.msra.mxu1 %v6271_v6  ;;  %3805 = vmatprep.subr.bf16.mxu0 %v6198_v7 }
 0x298   :  { %4581 = vmatprep.subr.bf16.mxu1 %v6327_v50 }
 0x299   :  { %2416 = vmatmul.mubr.bf16.vlgmr.msra.gmra.mrb[8].mxu0 %v7068_v27  ;;  %v6228_v27 = vld [vmem:[#allocation13 + $0x104] ss:$24 sps:$4 sm:$0xff]  }
 0x29a   :  { %3806 = vmatpush1.bf16.msra.mxu0 %v6196_v39  ;;  %3837 = vmatprep.mubr.bf16.mxu0 %v7081_v40  ;;  %v588_v40 = vrot.slane %v7156_v62, %v7120_v52 }
 0x29b   :  { %3807 = vmatprep.subr.bf16.mxu0 %v6204_v8  ;;  %v6256_v8 = vld [vmem:[#allocation13 + $0x1f0] ss:$24 sps:$4 sm:$0xff]  }
 0x29c   :  { %v5485_v29 = vadd.f32 %v7150_v13, %v588_v40  ;;  %v6274_v40 = vld [vmem:[#allocation13 + $0x280] ss:$24 sps:$4 sm:$0xff]  }
 0x29e   :  { %3808 = vmatpush1.bf16.msra.mxu0 %v6202_v9  ;;  %v6264_v9 = vld [vmem:[#allocation13 + $0x224] ss:$24 sps:$4 sm:$0xff]  }
 0x29f   :  { %3809 = vmatprep.subr.bf16.mxu0 %v6210_v10  ;;  %v6262_v10 = vld [vmem:[#allocation13 + $0x220] ss:$24 sps:$4 sm:$0xff]  }
 0x2a2   :  { %3810 = vmatpush1.bf16.msra.mxu0 %v6208_v11  ;;  %v6270_v11 = vld [vmem:[#allocation13 + $0x254] ss:$24 sps:$4 sm:$0xff]  }
 0x2a3   :  { %3811 = vmatprep.subr.bf16.mxu0 %v6216_v12  ;;  %v6268_v12 = vld [vmem:[#allocation13 + $0x250] ss:$24 sps:$4 sm:$0xff]  }
 0x2a6   :  { %3812 = vmatpush1.bf16.msra.mxu0 %v6214_v15  ;;  %v6276_v15 = vld [vmem:[#allocation13 + $0x284] ss:$24 sps:$4 sm:$0xff]  }
 0x2a7   :  { %3813 = vmatprep.subr.bf16.mxu0 %v6222_v16 }
 0x2aa   :  { %3814 = vmatpush1.bf16.msra.mxu0 %v6220_v19 }
 0x2ab   :  { %3815 = vmatprep.subr.bf16.mxu0 %v6228_v27 }
 0x2ac   :  { %v2212_v3 = vpop.f32.mrb[4].mxu0 }
 0x2ad   :  { %v3716_v28 = vpop.f32.mrb[4].mxu1  ;;  %v2213_v30 = vadd.f32 %v2212_v3, %v596_v17  ;;  %v2214_v33 = vpop.f32.mrb[5].mxu0  ;;  %v6325_v17 = vld [vmem:[#allocation16 + $0x100] ss:$8 sps:$4 sm:$0xff]   ;;  %v6339_v3 = vld [vmem:[#allocation16 + $0x124] ss:$8 sps:$4 sm:$0xff]  }
 0x2ae   :  { %v5493_v31 = vadd.f32 %v3716_v28, %v2654_v21  ;;  %v3718_v35 = vpop.f32.mrb[5].mxu1  ;;  %v2215_v37 = vadd.f32 %v2214_v33, %v600_v23  ;;  %v2216_v44 = vpop.f32.mrb[6].mxu0  ;;  %3816 = vmatpush1.bf16.msra.mxu0 %v6226_v25  ;;  %v6333_v23 = vld [vmem:[#allocation16 + $0x114] ss:$8 sps:$4 sm:$0xff]   ;;  %v6331_v25 = vld [vmem:[#allocation16 + $0x110] ss:$8 sps:$4 sm:$0xff]  }
 0x2af   :  { %v5494_v43 = vadd.f32 %v3718_v35, %v2658_v24  ;;  %v3720_v32 = vpop.f32.mrb[6].mxu1  ;;  %v7175_v46 = vadd.f32 %v7113_v38, %v2213_v30  ;;  %v2217_v48 = vpop.f32.mrb[7].mxu0  ;;  %3817 = vmatprep.subr.bf16.mxu0 %v6234_v26  ;;  %v6246_v38 = vld [vmem:[#allocation13 + $0x194] ss:$24 sps:$4 sm:$0xff]   ;;  %v6277_v24 = vld [vmem:[#allocation13 + $0x2b0] ss:$24 sps:$4 sm:$0xff]  }
 0x2b0   :  { %6444 = vtanh.f32 %v5493_v31  ;;  %v3721_v13 = vpop.f32.mrb[7].mxu1  ;;  %v7180_v34 = vadd.f32 %v7115_v41, %v2215_v37  ;;  %v6250_v41 = vld [vmem:[#allocation13 + $0x1c0] ss:$24 sps:$4 sm:$0xff]   ;;  %v6282_v26 = vld [vmem:[#allocation13 + $0x2e4] ss:$24 sps:$4 sm:$0xff]  }
 0x2b1   :  { %6446 = vtanh.f32 %v5494_v43  ;;  %v6280_v28 = vld [vmem:[#allocation13 + $0x2e0] ss:$24 sps:$4 sm:$0xff]   ;;  %v6285_v30 = vld [vmem:[#allocation13 + $0x314] ss:$24 sps:$4 sm:$0xff]   ;;  %v6283_v33 = vld [vmem:[#allocation13 + $0x310] ss:$24 sps:$4 sm:$0xff]  }
 0x2b2   :  { %6448 = vtanh.f32 %v5485_v29  ;;  %3818 = vmatpush1.bf16.msra.mxu0 %v6232_v45  ;;  %v6337_v29 = vld [vmem:[#allocation16 + $0x120] ss:$8 sps:$4 sm:$0xff]   ;;  %v6342_v31 = vld [vmem:[#allocation16 + $0x134] ss:$8 sps:$4 sm:$0xff]   ;;  %v6345_v37 = vld [vmem:[#allocation16 + $0x144] ss:$8 sps:$4 sm:$0xff]  }
 0x2b3   :  { %6450 = vtanh.f32 %v5486_v36  ;;  %3819 = vmatprep.subr.bf16.mxu0 %v6240_v55  ;;  %v6288_v35 = vld [vmem:[#allocation13 + $0x344] ss:$24 sps:$4 sm:$0xff]   ;;  %v6286_v43 = vld [vmem:[#allocation13 + $0x340] ss:$24 sps:$4 sm:$0xff]   ;;  %v6291_v44 = vld [vmem:[#allocation13 + $0x374] ss:$24 sps:$4 sm:$0xff]  }
 0x2b4   :  { %v6340_v36 = vld [vmem:[#allocation16 + $0x130] ss:$8 sps:$4 sm:$0xff]   ;;  %v6343_v45 = vld [vmem:[#allocation16 + $0x140] ss:$8 sps:$4 sm:$0xff]   ;;  %v6348_v32 = vld [vmem:[#allocation16 + $0x154] ss:$8 sps:$4 sm:$0xff]  }
 0x2b5   :  { %v6289_v48 = vld [vmem:[#allocation13 + $0x370] ss:$24 sps:$4 sm:$0xff]   ;;  %v6294_v55 = vld [vmem:[#allocation13 + $0x3a4] ss:$24 sps:$4 sm:$0xff]  }
 0x2b6   :  { %3820 = vmatpush1.bf16.msra.mxu0 %v6238_v14  ;;  %v6346_v13 = vld [vmem:[#allocation16 + $0x150] ss:$8 sps:$4 sm:$0xff]   ;;  %v6351_v14 = vld [vmem:[#allocation16 + $0x164] ss:$8 sps:$4 sm:$0xff]  }
 0x2b7   :  { %3821 = vmatprep.subr.bf16.mxu0 %v6246_v38  ;;  %v6354_v38 = vld [vmem:[#allocation16 + $0x174] ss:$8 sps:$4 sm:$0xff]  }
 0x2ba   :  { %v6445_v0 = vpop.eup %6444  ;;  %3822 = vmatpush1.bf16.msra.mxu0 %v6244_v58  ;;  %v6295_v58 = vld [vmem:[#allocation13 + $0x3d0] ss:$24 sps:$4 sm:$0xff]  }
 0x2bb   :  { %v6447_v1 = vpop.eup %6446  ;;  %v3928_v18 = vadd.f32 %v6445_v0, %v3904_v57  ;;  %3823 = vmatprep.subr.bf16.mxu0 %v6252_v59  ;;  %v6297_v57 = vld [vmem:[#allocation13 + $0x3d4] ss:$24 sps:$4 sm:$0xff]   ;;  %v6300_v59 = vld [vmem:[#allocation13 + $0x404] ss:$24 sps:$4 sm:$0xff]  }
 0x2bc   :  { %v6449_v2 = vpop.eup %6448  ;;  %v3929_v6 = vadd.f32 %v6447_v1, %v3912_v61  ;;  %v6352_v61 = vld [vmem:[#allocation16 + $0x170] ss:$8 sps:$4 sm:$0xff]   ;;  %v6358_v0 = vld [vmem:[#allocation16 + $0x184] ss:$8 sps:$4 sm:$0xff]  }
 0x2bd   :  { %v6451_v7 = vpop.eup %6450  ;;  %v3934_v50 = vmul.f32 %v6449_v2, %v3928_v18  ;;  %v6298_v1 = vld [vmem:[#allocation13 + $0x400] ss:$24 sps:$4 sm:$0xff]   ;;  %v6303_v18 = vld [vmem:[#allocation13 + $0x434] ss:$24 sps:$4 sm:$0xff]   ;;  %v7187_v2 = vsub.s32 4, %v7039_v42 }
 0x2be   :  { %v3935_v39 = vmul.f32 %v6451_v7, %v3929_v6  ;;  %3824 = vmatpush1.bf16.msra.mxu0 %v6250_v41  ;;  %v6356_v41 = vld [vmem:[#allocation16 + $0x180] ss:$8 sps:$4 sm:$0xff]   ;;  %v7192_v7 = vsub.s32 5, %v7039_v42 }
 0x2bf   :  { %6452 = vtanh.f32 %v3934_v50  ;;  %3825 = vmatprep.subr.bf16.mxu0 %v6258_v5  ;;  %v6361_v5 = vld [vmem:[#allocation16 + $0x194] ss:$8 sps:$4 sm:$0xff]   ;;  %v218_v6 = vrot.slane %v7117_v51, %v7187_v2  ;;  %v6301_v50 = vld [vmem:[#allocation13 + $0x430] ss:$24 sps:$4 sm:$0xff]   ;;  %v6309_v42 = vld [vmem:[#allocation13 + $0x494] ss:$24 sps:$4 sm:$0xff]  }
 0x2c0   :  { %6454 = vtanh.f32 %v3935_v39  ;;  %v6306_v39 = vld [vmem:[#allocation13 + $0x464] ss:$24 sps:$4 sm:$0xff]  }
 0x2c2   :  { %3826 = vmatpush1.bf16.msra.mxu0 %v6256_v8  ;;  %v6359_v8 = vld [vmem:[#allocation16 + $0x190] ss:$8 sps:$4 sm:$0xff]  }
 0x2c3   :  { %3827 = vmatprep.subr.bf16.mxu0 %v6264_v9  ;;  %v222_v9 = vrot.slane %v7117_v51, %v7192_v7  ;;  %v6307_v51 = vld [vmem:[#allocation13 + $0x490] ss:$24 sps:$4 sm:$0xff]  }
 0x2c6   :  { %3828 = vmatpush1.bf16.msra.mxu0 %v6262_v10  ;;  %v6364_v10 = vld [vmem:[#allocation16 + $0x1a4] ss:$8 sps:$4 sm:$0xff]  }
 0x2c7   :  { %3829 = vmatprep.subr.bf16.mxu0 %v6270_v11  ;;  %v240_v11 = vcombine.low %v218_v6, %v222_v9 }
 0x2c9   :  { %v6453_v16 = vpop.eup %6452 }
 0x2ca   :  { %v6455_v19 = vpop.eup %6454  ;;  %3830 = vmatpush1.bf16.msra.mxu0 %v6268_v12  ;;  %v3946_v21 = vpack.c.bf16 %v6453_v16, %v6453_v16  ;;  %v6304_v12 = vld [vmem:[#allocation13 + $0x460] ss:$24 sps:$4 sm:$0xff]   ;;  %v6362_v16 = vld [vmem:[#allocation16 + $0x1a0] ss:$8 sps:$4 sm:$0xff]  }
 0x2cb   :  { %v3947_v27 = vpack.c.bf16 %v6455_v19, %v6455_v19  ;;  %3831 = vmatprep.subr.bf16.mxu0 %v6276_v15  ;;  %v196_v15 = vld [vmem:[%s7235_s0 + $0x8] sm:$0xf]  ;;  %v247_v19 = vrot.slane %v240_v11, %v7042_v49  ;;  %v6380_v11 = vld [vmem:[#allocation16 + $0x200] ss:$8 sps:$4 sm:$0xff]   ;;  %s6805_s0 = smov [#allocation22]  }
 0x2cd   :  { %4572 = vmatprep.mubr.bf16.mxu1 %v3947_v27  ;;  %v6367_v27 = vld [vmem:[#allocation16 + $0x1b4] ss:$8 sps:$4 sm:$0xff]  }
 0x2ce   :  { %4573 = vmatmul.mubr.bf16.vlgmr.msra.gmra.mrb[12].mxu1 %v3946_v21  ;;  %3832 = vmatpush1.bf16.msra.mxu0 %v6274_v40  ;;  %v251_v40 = vmul.f32 %v247_v19, %v196_v15  ;;  %v6365_v21 = vld [vmem:[#allocation16 + $0x1b0] ss:$8 sps:$4 sm:$0xff]   ;;  %v6386_v15 = vld [vmem:[#allocation16 + $0x220] ss:$8 sps:$4 sm:$0xff]   ;;  %v6394_v19 = vld [vmem:[#allocation16 + $0x244] ss:$8 sps:$4 sm:$0xff]  }
 0x2cf   :  { %4582 = vmatpush1.bf16.msra.mxu1 %v6325_v17  ;;  %3833 = vmatprep.subr.bf16.mxu0 %v6279_v22  ;;  %v6312_v17 = vld [vmem:[#allocation13 + $0x4c4] ss:$24 sps:$4 sm:$0xff]   ;;  %v6370_v22 = vld [vmem:[#allocation16 + $0x1c4] ss:$8 sps:$4 sm:$0xff]  }
 0x2d0   :  { %4583 = vmatprep.subr.bf16.mxu1 %v6333_v23  ;;  %253 = vst [vmem:[%s7248_s13 + $0x8] sm:$0xf] %v251_v40  ;;  %v6310_v23 = vld [vmem:[#allocation13 + $0x4c0] ss:$24 sps:$4 sm:$0xff]   ;;  %s4851_s13 = sshll.u32 %s6805_s0, 4  ;;  %s4852_s13 = int_to_ptr.vmem [resolvable:$true] %s4851_s13 }
 0x2d1   :  { %v6397_v40 = vld [vmem:[#allocation16 + $0x254] ss:$8 sps:$4 sm:$0xff]   ;;  %s6748_s23 = scalar_lea.vmem %s4852_s13, 32  ;;  %p6753_p13 = scmp.lt.s32.totalorder %s4852_s13, %s4852_s13 }
 0x2d2   :  { %3834 = vmatpush1.bf16.msra.mxu0 %v6277_v24  ;;  %v6315_v24 = vld [vmem:[#allocation13 + $0x4f4] ss:$24 sps:$4 sm:$0xff]   ;;  %p6749_p12 = scmp.ne.s32.totalorder %s4852_s13, %s6748_s23  ;;  %p6754_p0 = scmp.lt.s32.totalorder %s6748_s23, %s6748_s23 }
 0x2d3   :  { %4584 = vmatpush1.bf16.msra.mxu1 %v6331_v25  ;;  %3835 = vmatprep.subr.bf16.mxu0 %v6282_v26  ;;  %v6368_v25 = vld [vmem:[#allocation16 + $0x1c0] ss:$8 sps:$4 sm:$0xff]   ;;  %v6373_v26 = vld [vmem:[#allocation16 + $0x1d4] ss:$8 sps:$4 sm:$0xff]  }
 0x2d4   :  { %4585 = vmatprep.subr.bf16.mxu1 %v6339_v3  ;;  %v6313_v3 = vld [vmem:[#allocation13 + $0x4f0] ss:$24 sps:$4 sm:$0xff]   ;;  %p6755_p1 = por %p6754_p0, %p6753_p13 }
 0x2d6   :  { %3836 = vmatpush1.bf16.msra.mxu0 %v6280_v28  ;;  %v6318_v28 = vld [vmem:[#allocation13 + $0x524] ss:$24 sps:$4 sm:$0xff]   ;;  %p6756_p2 = pnand %p6755_p1, %p6749_p12 }
 0x2d7   :  { %4586 = vmatpush1.bf16.msra.mxu1 %v6337_v29  ;;  %3846 = vmatprep.subr.bf16.mxu0 %v6285_v30  ;;  %v6371_v29 = vld [vmem:[#allocation16 + $0x1d0] ss:$8 sps:$4 sm:$0xff]   ;;  %v6376_v30 = vld [vmem:[#allocation16 + $0x1e4] ss:$8 sps:$4 sm:$0xff]  }
 0x2d8   :  { %4587 = vmatprep.subr.bf16.mxu1 %v6342_v31  ;;  %v6316_v31 = vld [vmem:[#allocation13 + $0x520] ss:$24 sps:$4 sm:$0xff]  }
 0x2d9   :  { %3838 = vmatmul.mubr.bf16.vlgmr.msra.gmra.mrb[12].mxu0 %v7093_v47  ;;  %v6292_v47 = vld [vmem:[#allocation13 + $0x3a0] ss:$24 sps:$4 sm:$0xff]  }
 0x2da   :  { %3847 = vmatpush1.bf16.msra.mxu0 %v6283_v33  ;;  %3878 = vmatprep.mubr.bf16.mxu0 %v7095_v53  ;;  %v6349_v53 = vld [vmem:[#allocation16 + $0x160] ss:$8 sps:$4 sm:$0xff]  }
 0x2db   :  { %3848 = vmatprep.subr.bf16.mxu0 %v6288_v35  ;;  %4588 = vmatpush1.bf16.msra.mxu1 %v6340_v36  ;;  %v6321_v33 = vld [vmem:[#allocation13 + $0x554] ss:$24 sps:$4 sm:$0xff]   ;;  %v6379_v36 = vld [vmem:[#allocation16 + $0x1f4] ss:$8 sps:$4 sm:$0xff]  }
 0x2dc   :  { %4589 = vmatprep.subr.bf16.mxu1 %v6345_v37  ;;  %v6374_v35 = vld [vmem:[#allocation16 + $0x1e0] ss:$8 sps:$4 sm:$0xff]  }
 0x2dd   :  { %v6319_v37 = vld [vmem:[#allocation13 + $0x550] ss:$24 sps:$4 sm:$0xff]  }
 0x2de   :  { %3849 = vmatpush1.bf16.msra.mxu0 %v6286_v43  ;;  %v6324_v43 = vld [vmem:[#allocation13 + $0x584] ss:$24 sps:$4 sm:$0xff]  }
 0x2df   :  { %3850 = vmatprep.subr.bf16.mxu0 %v6291_v44  ;;  %4590 = vmatpush1.bf16.msra.mxu1 %v6343_v45  ;;  %v6377_v44 = vld [vmem:[#allocation16 + $0x1f0] ss:$8 sps:$4 sm:$0xff]   ;;  %v6382_v45 = vld [vmem:[#allocation16 + $0x204] ss:$8 sps:$4 sm:$0xff]  }
 0x2e0   :  { %4591 = vmatprep.subr.bf16.mxu1 %v6348_v32  ;;  %v6322_v32 = vld [vmem:[#allocation13 + $0x580] ss:$24 sps:$4 sm:$0xff]  }
 0x2e2   :  { %3851 = vmatpush1.bf16.msra.mxu0 %v6289_v48  ;;  %v6330_v48 = vld [vmem:[#allocation13 + $0x5b4] ss:$24 sps:$4 sm:$0xff]  }
 0x2e3   :  { %3852 = vmatprep.subr.bf16.mxu0 %v6294_v55  ;;  %4592 = vmatpush1.bf16.msra.mxu1 %v6346_v13  ;;  %v6328_v55 = vld [vmem:[#allocation13 + $0x5b0] ss:$24 sps:$4 sm:$0xff]   ;;  %v6336_v13 = vld [vmem:[#allocation13 + $0x5e4] ss:$24 sps:$4 sm:$0xff]  }
 0x2e4   :  { %4593 = vmatprep.subr.bf16.mxu1 %v6351_v14  ;;  %v6334_v14 = vld [vmem:[#allocation13 + $0x5e0] ss:$24 sps:$4 sm:$0xff]  }
 0x2e6   :  { %3853 = vmatpush1.bf16.msra.mxu0 %v6292_v47  ;;  %v2662_v47 = vrot.slane %v7158_v20, %v7130_v60 }
 0x2e7   :  { %3854 = vmatprep.subr.bf16.mxu0 %v6297_v57  ;;  %4594 = vmatpush1.bf16.msra.mxu1 %v6349_v53  ;;  %v2666_v57 = vrot.slane %v7158_v20, %v7135_v4 }
 0x2e8   :  { %4595 = vmatprep.subr.bf16.mxu1 %v6354_v38 }
 0x2ea   :  { %3855 = vmatpush1.bf16.msra.mxu0 %v6295_v58 }
 0x2eb   :  { %3856 = vmatprep.subr.bf16.mxu0 %v6300_v59  ;;  %4596 = vmatpush1.bf16.msra.mxu1 %v6352_v61 }
 0x2ec   :  { %4597 = vmatprep.subr.bf16.mxu1 %v6358_v0  ;;  %v3897_v0 = vcombine.high %v7177_v56, %v7177_v56 }
 0x2ee   :  { %3857 = vmatpush1.bf16.msra.mxu0 %v6298_v1 }
 0x2ef   :  { %3858 = vmatprep.subr.bf16.mxu0 %v6303_v18  ;;  %4598 = vmatpush1.bf16.msra.mxu1 %v6356_v41 }
 0x2f0   :  { %4599 = vmatprep.subr.bf16.mxu1 %v6361_v5 }
 0x2f2   :  { %3859 = vmatpush1.bf16.msra.mxu0 %v6301_v50 }
 0x2f3   :  { %3860 = vmatprep.subr.bf16.mxu0 %v6306_v39  ;;  %4600 = vmatpush1.bf16.msra.mxu1 %v6359_v8 }
 0x2f4   :  { %4601 = vmatprep.subr.bf16.mxu1 %v6364_v10 }
 0x2f6   :  { %3861 = vmatpush1.bf16.msra.mxu0 %v6304_v12  ;;  %v6385_v12 = vld [vmem:[#allocation16 + $0x214] ss:$8 sps:$4 sm:$0xff]  }
 0x2f7   :  { %3862 = vmatprep.subr.bf16.mxu0 %v6309_v42  ;;  %4602 = vmatpush1.bf16.msra.mxu1 %v6362_v16  ;;  %v6391_v42 = vld [vmem:[#allocation16 + $0x234] ss:$8 sps:$4 sm:$0xff]   ;;  %v6389_v16 = vld [vmem:[#allocation16 + $0x230] ss:$8 sps:$4 sm:$0xff]  }
 0x2f8   :  { %4603 = vmatprep.subr.bf16.mxu1 %v6367_v27  ;;  %v6392_v27 = vld [vmem:[#allocation16 + $0x240] ss:$8 sps:$4 sm:$0xff]  }
 0x2fa   :  { %3863 = vmatpush1.bf16.msra.mxu0 %v6307_v51  ;;  %v6395_v51 = vld [vmem:[#allocation16 + $0x250] ss:$8 sps:$4 sm:$0xff]  }
 0x2fb   :  { %3864 = vmatprep.subr.bf16.mxu0 %v6312_v17  ;;  %4604 = vmatpush1.bf16.msra.mxu1 %v6365_v21  ;;  %v6400_v17 = vld [vmem:[#allocation16 + $0x264] ss:$8 sps:$4 sm:$0xff]   ;;  %v6398_v21 = vld [vmem:[#allocation16 + $0x260] ss:$8 sps:$4 sm:$0xff]  }
 0x2fc   :  { %4605 = vmatprep.subr.bf16.mxu1 %v6370_v22  ;;  %v6403_v22 = vld [vmem:[#allocation16 + $0x274] ss:$8 sps:$4 sm:$0xff]  }
 0x2fe   :  { %3865 = vmatpush1.bf16.msra.mxu0 %v6310_v23  ;;  %v6401_v23 = vld [vmem:[#allocation16 + $0x270] ss:$8 sps:$4 sm:$0xff]  }
 0x2ff   :  { %3866 = vmatprep.subr.bf16.mxu0 %v6315_v24  ;;  %4606 = vmatpush1.bf16.msra.mxu1 %v6368_v25  ;;  %v604_v24 = vrot.slane %v7156_v62, %v7187_v2  ;;  %v6406_v25 = vld [vmem:[#allocation16 + $0x284] ss:$8 sps:$4 sm:$0xff]  }
 0x300   :  { %4607 = vmatprep.subr.bf16.mxu1 %v6373_v26 }
 0x302   :  { %3867 = vmatpush1.bf16.msra.mxu0 %v6313_v3  ;;  %v6404_v3 = vld [vmem:[#allocation16 + $0x280] ss:$8 sps:$4 sm:$0xff]  }
 0x303   :  { %3868 = vmatprep.subr.bf16.mxu0 %v6318_v28  ;;  %4608 = vmatpush1.bf16.msra.mxu1 %v6371_v29 }
 0x304   :  { %4609 = vmatprep.subr.bf16.mxu1 %v6376_v30 }
 0x306   :  { %3869 = vmatpush1.bf16.msra.mxu0 %v6316_v31 }
 0x307   :  { %3870 = vmatprep.subr.bf16.mxu0 %v6321_v33  ;;  %4610 = vmatpush1.bf16.msra.mxu1 %v6374_v35  ;;  %v6407_v33 = vld [vmem:[#allocation16 + $0x290] ss:$8 sps:$4 sm:$0xff]   ;;  %v6409_v35 = vld [vmem:[#allocation16 + $0x294] ss:$8 sps:$4 sm:$0xff]  }
 0x308   :  { %4611 = vmatprep.subr.bf16.mxu1 %v6379_v36  ;;  %v6412_v36 = vld [vmem:[#allocation16 + $0x2a4] ss:$8 sps:$4 sm:$0xff]  }
 0x30a   :  { %3871 = vmatpush1.bf16.msra.mxu0 %v6319_v37  ;;  %v6410_v37 = vld [vmem:[#allocation16 + $0x2a0] ss:$8 sps:$4 sm:$0xff]  }
 0x30b   :  { %3872 = vmatprep.subr.bf16.mxu0 %v6324_v43  ;;  %4612 = vmatpush1.bf16.msra.mxu1 %v6377_v44  ;;  %v6415_v43 = vld [vmem:[#allocation16 + $0x2b4] ss:$8 sps:$4 sm:$0xff]   ;;  %v6413_v44 = vld [vmem:[#allocation16 + $0x2b0] ss:$8 sps:$4 sm:$0xff]  }
 0x30c   :  { %4622 = vmatprep.subr.bf16.mxu1 %v6382_v45  ;;  %v6418_v45 = vld [vmem:[#allocation16 + $0x2c4] ss:$8 sps:$4 sm:$0xff]  }
 0x30e   :  { %3873 = vmatpush1.bf16.msra.mxu0 %v6322_v32  ;;  %v6416_v32 = vld [vmem:[#allocation16 + $0x2c0] ss:$8 sps:$4 sm:$0xff]  }
 0x30f   :  { %3874 = vmatprep.subr.bf16.mxu0 %v6330_v48  ;;  %v6421_v48 = vld [vmem:[#allocation16 + $0x2d4] ss:$8 sps:$4 sm:$0xff]  }
 0x312   :  { %3875 = vmatpush1.bf16.msra.mxu0 %v6328_v55  ;;  %v6419_v55 = vld [vmem:[#allocation16 + $0x2d0] ss:$8 sps:$4 sm:$0xff]  }
 0x313   :  { %3876 = vmatprep.subr.bf16.mxu0 %v6336_v13  ;;  %v6424_v13 = vld [vmem:[#allocation16 + $0x2e4] ss:$8 sps:$4 sm:$0xff]  }
 0x316   :  { %3877 = vmatpush1.bf16.msra.mxu0 %v6334_v14  ;;  %v6422_v14 = vld [vmem:[#allocation16 + $0x2e0] ss:$8 sps:$4 sm:$0xff]  }
 0x319   :  { %3879 = vmatmul.mubr.bf16.vlgmr.msra.gmra.mrb[12].mxu0 %v7103_v63  ;;  %v3911_v63 = vrot.slane %v3897_v0, %v7042_v49  ;;  %v6383_v49 = vld [vmem:[#allocation16 + $0x210] ss:$8 sps:$4 sm:$0xff]  }
 0x31a   :  { %v6433_v0 = vld [vmem:[#allocation19 + $0x10] sm:$0xff]  }
 0x31b   :  { %v3913_v60 = vcombine.high %v3911_v63, %v3911_v63 }
 0x32d   :  { %v3798_v53 = vpop.f32.mrb[8].mxu1 }
 0x32e   :  { %v5495_v38 = vadd.f32 %v3798_v53, %v2662_v47  ;;  %v3800_v58 = vpop.f32.mrb[9].mxu1  ;;  %v6427_v47 = vld [vmem:[#allocation16 + $0x2f4] ss:$8 sps:$4 sm:$0xff]   ;;  %v6428_v53 = vld [vmem:[#allocation19 + $0x40] sm:$0xff]  }
 0x32f   :  { %v5496_v59 = vadd.f32 %v3800_v58, %v2666_v57  ;;  %v3802_v61 = vpop.f32.mrb[10].mxu1  ;;  %v6425_v57 = vld [vmem:[#allocation16 + $0x2f0] ss:$8 sps:$4 sm:$0xff]   ;;  %5463 = vmatprep.subr.bf16.mxu0 %v6428_v53 }
 0x330   :  { %6456 = vtanh.f32 %v5495_v38  ;;  %v3803_v1 = vpop.f32.mrb[11].mxu1  ;;  %v6429_v38 = vld [vmem:[#allocation19] sm:$0xff]   ;;  %v6430_v58 = vld [vmem:[#allocation19 + $0x48] sm:$0xff]   ;;  %v6432_v61 = vld [vmem:[#allocation19 + $0x50] sm:$0xff]  }
 0x331   :  { %6458 = vtanh.f32 %v5496_v59  ;;  %5464 = vmatpush3.bf16.msra.mxu0 %v6429_v38  ;;  %v6431_v59 = vld [vmem:[#allocation19 + $0x8] sm:$0xff]   ;;  %v6434_v1 = vld [vmem:[#allocation19 + $0x58] sm:$0xff]  }
 0x332   :  { %6460 = vtanh.f32 %v7175_v46  ;;  %5465 = vmatprep.subr.bf16.mxu0 %v6430_v58 }
 0x333   :  { %6462 = vtanh.f32 %v7180_v34  ;;  %v6388_v34 = vld [vmem:[#allocation16 + $0x224] ss:$8 sps:$4 sm:$0xff]  }
 0x335   :  { %5466 = vmatpush3.bf16.msra.mxu0 %v6431_v59 }
 0x336   :  { %5467 = vmatprep.subr.bf16.mxu0 %v6432_v61 }
 0x339   :  { %5468 = vmatpush3.bf16.msra.mxu0 %v6433_v0 }
 0x33a   :  { %v6457_v18 = vpop.eup %6456  ;;  %5469 = vmatprep.subr.bf16.mxu0 %v6434_v1 }
 0x33b   :  { %v6459_v4 = vpop.eup %6458  ;;  %v3930_v41 = vadd.f32 %v6457_v18, %v3911_v63  ;;  %v6435_v63 = vld [vmem:[#allocation19 + $0x18] sm:$0xff]   ;;  %v608_v18 = vrot.slane %v7156_v62, %v7192_v7 }
 0x33c   :  { %v6461_v5 = vpop.eup %6460  ;;  %v3931_v6 = vadd.f32 %v6459_v4, %v3913_v60  ;;  %v2670_v60 = vrot.slane %v7158_v20, %v7187_v2  ;;  %v2674_v4 = vrot.slane %v7158_v20, %v7192_v7 }
 0x33d   :  { %v6463_v50 = vpop.eup %6462  ;;  %v3936_v39 = vmul.f32 %v6461_v5, %v3930_v41  ;;  %5470 = vmatpush3.bf16.msra.mxu0 %v6435_v63 }
 0x33e   :  { %v3937_v8 = vmul.f32 %v6463_v50, %v3931_v6 }
 0x33f   :  { %6464 = vtanh.f32 %v3936_v39 }
 0x340   :  { %6466 = vtanh.f32 %v3937_v8 }
 0x349   :  { %v6465_v56 = vpop.eup %6464 }
 0x34a   :  { %v6467_v9 = vpop.eup %6466  ;;  %v3948_v46 = vpack.c.bf16 %v6465_v56, %v6465_v56 }
 0x34b   :  { %v3949_v10 = vpack.c.bf16 %v6467_v9, %v6467_v9  ;;  %v5349_v9 = vld.sshfl [vmem:[#allocation8 + $0x8] sm:$0x33 pattern:$0x76325410] }
 0x34d   :  { %4613 = vmatprep.mubr.bf16.mxu1 %v3949_v10  ;;  %v3921_v10 = vcombine.high %v5349_v9, %v5349_v9 }
 0x34e   :  { %4614 = vmatmul.mubr.bf16.vlgmr.msra.gmra.mrb[12].mxu1 %v3948_v46 }
 0x34f   :  { %4623 = vmatpush1.bf16.msra.mxu1 %v6380_v11 }
 0x350   :  { %4624 = vmatprep.subr.bf16.mxu1 %v6385_v12 }
 0x353   :  { %4625 = vmatpush1.bf16.msra.mxu1 %v6383_v49 }
 0x354   :  { %4626 = vmatprep.subr.bf16.mxu1 %v6388_v34 }
 0x357   :  { %4627 = vmatpush1.bf16.msra.mxu1 %v6386_v15 }
 0x358   :  { %4628 = vmatprep.subr.bf16.mxu1 %v6391_v42 }
 0x35b   :  { %4629 = vmatpush1.bf16.msra.mxu1 %v6389_v16 }
 0x35c   :  { %4630 = vmatprep.subr.bf16.mxu1 %v6394_v19  ;;  %v6436_v19 = vld [vmem:[#allocation19 + $0x60] sm:$0xff]  }
 0x35d   :  { %5471 = vmatprep.subr.bf16.mxu0 %v6436_v19 }
 0x35f   :  { %4631 = vmatpush1.bf16.msra.mxu1 %v6392_v27  ;;  %v6437_v27 = vld [vmem:[#allocation19 + $0x20] sm:$0xff]  }
 0x360   :  { %4632 = vmatprep.subr.bf16.mxu1 %v6397_v40  ;;  %5472 = vmatpush3.bf16.msra.mxu0 %v6437_v27  ;;  %v6438_v40 = vld [vmem:[#allocation19 + $0x68] sm:$0xff]  }
 0x361   :  { %5473 = vmatprep.subr.bf16.mxu0 %v6438_v40 }
 0x363   :  { %4633 = vmatpush1.bf16.msra.mxu1 %v6395_v51  ;;  %v6439_v51 = vld [vmem:[#allocation19 + $0x28] sm:$0xff]  }
 0x364   :  { %4634 = vmatprep.subr.bf16.mxu1 %v6400_v17  ;;  %5474 = vmatpush3.bf16.msra.mxu0 %v6439_v51  ;;  %v6440_v17 = vld [vmem:[#allocation19 + $0x70] sm:$0xff]  }
 0x365   :  { %5475 = vmatprep.subr.bf16.mxu0 %v6440_v17 }
 0x367   :  { %4635 = vmatpush1.bf16.msra.mxu1 %v6398_v21  ;;  %v6441_v21 = vld [vmem:[#allocation19 + $0x30] sm:$0xff]  }
 0x368   :  { %4636 = vmatprep.subr.bf16.mxu1 %v6403_v22  ;;  %5476 = vmatpush3.bf16.msra.mxu0 %v6441_v21  ;;  %v6442_v22 = vld [vmem:[#allocation19 + $0x78] sm:$0xff]  }
 0x369   :  { %5477 = vmatprep.subr.bf16.mxu0 %v6442_v22 }
 0x36b   :  { %4637 = vmatpush1.bf16.msra.mxu1 %v6401_v23  ;;  %v6443_v23 = vld [vmem:[#allocation19 + $0x38] sm:$0xff]  }
 0x36c   :  { %v2417_v26 = vpop.f32.mrb[8].mxu0  ;;  %4638 = vmatprep.subr.bf16.mxu1 %v6406_v25  ;;  %5478 = vmatpush3.bf16.msra.mxu0 %v6443_v23 }
 0x36d   :  { %v5491_v28 = vadd.f32 %v2417_v26, %v604_v24  ;;  %v2419_v29 = vpop.f32.mrb[9].mxu0  ;;  %v4048_v24 = vld [vmem:[#allocation17] sm:$0x3] }
 0x36e   :  { %v2421_v30 = vpop.f32.mrb[10].mxu0  ;;  %v5492_v50 = vadd.f32 %v2419_v29, %v608_v18  ;;  %v4053_v25 = vrot.slane %v4048_v24, %v7120_v52  ;;  %v4057_v26 = vrot.slane %v4048_v24, %v7123_v54 }
 0x36f   :  { %4639 = vmatpush1.bf16.msra.mxu1 %v6404_v3  ;;  %v2422_v31 = vpop.f32.mrb[11].mxu0 }
 0x370   :  { %4640 = vmatprep.subr.bf16.mxu1 %v6409_v35 }
 0x373   :  { %4641 = vmatpush1.bf16.msra.mxu1 %v6407_v33 }
 0x374   :  { %4642 = vmatprep.subr.bf16.mxu1 %v6412_v36 }
 0x377   :  { %4643 = vmatpush1.bf16.msra.mxu1 %v6410_v37 }
 0x378   :  { %4644 = vmatprep.subr.bf16.mxu1 %v6415_v43 }
 0x37b   :  { %4645 = vmatpush1.bf16.msra.mxu1 %v6413_v44 }
 0x37c   :  { %4646 = vmatprep.subr.bf16.mxu1 %v6418_v45  ;;  %v5446_v45 = vld [vmem:[#allocation20] ss:$0 sm:$0xff] }
 0x37f   :  { %4647 = vmatpush1.bf16.msra.mxu1 %v6416_v32 }
 0x380   :  { %4648 = vmatprep.subr.bf16.mxu1 %v6421_v48 }
 0x383   :  { %4649 = vmatpush1.bf16.msra.mxu1 %v6419_v55 }
 0x384   :  { %4650 = vmatprep.subr.bf16.mxu1 %v6424_v13 }
 0x387   :  { %4651 = vmatpush1.bf16.msra.mxu1 %v6422_v14 }
 0x388   :  { %4652 = vmatprep.subr.bf16.mxu1 %v6427_v47 }
 0x38b   :  { %4653 = vmatpush1.bf16.msra.mxu1 %v6425_v57 }
 0x3ec   :  { %v3880_v41 = vpop.f32.mrb[12].mxu0 }
 0x3ed   :  { %v5497_v5 = vadd.f32 %v3880_v41, %v2670_v60  ;;  %v3882_v6 = vpop.f32.mrb[13].mxu0 }
 0x3ee   :  { %v5498_v39 = vadd.f32 %v3882_v6, %v2674_v4  ;;  %v3884_v8 = vpop.f32.mrb[14].mxu0 }
 0x3ef   :  { %6468 = vtanh.f32 %v5497_v5  ;;  %v3885_v56 = vpop.f32.mrb[15].mxu0 }
 0x3f0   :  { %6470 = vtanh.f32 %v5498_v39 }
 0x3f1   :  { %6472 = vtanh.f32 %v5491_v28 }
 0x3f2   :  { %6474 = vtanh.f32 %v5492_v50 }
 0x3f9   :  { %v6469_v2 = vpop.eup %6468 }
 0x3fa   :  { %v6471_v11 = vpop.eup %6470  ;;  %v3932_v46 = vadd.f32 %v6469_v2, %v5349_v9 }
 0x3fb   :  { %v6473_v62 = vpop.eup %6472  ;;  %v3933_v12 = vadd.f32 %v6471_v11, %v3921_v10 }
 0x3fc   :  { %v6475_v49 = vpop.eup %6474  ;;  %v3938_v20 = vmul.f32 %v6473_v62, %v3932_v46 }
 0x3fd   :  { %v3939_v7 = vmul.f32 %v6475_v49, %v3933_v12 }
 0x3fe   :  { %6476 = vtanh.f32 %v3938_v20 }
 0x3ff   :  { %6478 = vtanh.f32 %v3939_v7 }
 0x408   :  { %v6477_v34 = vpop.eup %6476 }
 0x409   :  { %v6479_v15 = vpop.eup %6478  ;;  %v3950_v16 = vpack.c.bf16 %v6477_v34, %v6477_v34 }
 0x40a   :  { %v3951_v42 = vpack.c.bf16 %v6479_v15, %v6479_v15 }
 0x40c   :  { %4654 = vmatprep.mubr.bf16.mxu1 %v3951_v42 }
 0x40d   :  { %4655 = vmatmul.mubr.bf16.vlgmr.msra.gmra.mrb[12].mxu1 %v3950_v16 }
 0x4e0   :  { %v4656_v3 = vpop.f32.mrb[12].mxu1 }
 0x4e1   :  { %v5499_v28 = vadd.f32 %v4656_v3, %v4053_v25  ;;  %v4658_v29 = vpop.f32.mrb[13].mxu1 }
 0x4e2   :  { %v5500_v30 = vadd.f32 %v4658_v29, %v4057_v26  ;;  %v4660_v31 = vpop.f32.mrb[14].mxu1 }
 0x4e3   :  { %6480 = vtanh.f32 %v5499_v28  ;;  %v4661_v33 = vpop.f32.mrb[15].mxu1 }
 0x4e4   :  { %6482 = vtanh.f32 %v5500_v30 }
 0x4ed   :  { %v6481_v35 = vpop.eup %6480 }
 0x4ee   :  { %v6483_v36 = vpop.eup %6482  ;;  %v4665_v43 = vpack.c.bf16 %v6481_v35, %v6481_v35 }
 0x4ef   :  { %v4666_v37 = vpack.c.bf16 %v6483_v36, %v6483_v36 }
 0x4f1   :  { %4834 = vmatprep.mubr.bf16.mxu0 %v4666_v37 }
 0x4f2   :  { %4835 = vmatmul.mubr.bf16.vlgmr.msra.gmra.mrb[16].mxu0 %v4665_v43 }
 0x5c5   :  { %v5479_v44 = vpop.f32.mrb[16].mxu0 }
 0x5c6   :  { %v5480_v32 = vpop.f32.mrb[17].mxu0 }
 0x5c7   :  { %v5481_v52 = vadd.f32 %v5480_v32, %v5479_v44  ;;  %v5482_v54 = vpop.f32.mrb[18].mxu0 }
 0x5c8   :  { %v5483_v48 = vpop.f32.mrb[19].mxu0 }
 0x5c9   :  { %v4837_v55 = vadd.f32 %v5481_v52, %v5446_v45 }
 0x5cb   :  { %4842 = vst [vmem:[#allocation22] sm:$0x3] %v4837_v55 }
 0x5cc   :  { %6759 = shalt.err (!%p6756_p2)
}
 0x5cd   :  { %s6760_s9 = scalar_lea.hbm %s7249_s14, 32 }
 0x5ce   :  { %p6761_p3 = scmp.ne.s32.totalorder %s7249_s14, %s6760_s9  ;;  %p6764_p4 = scmp.lt.u32.totalorder %s6760_s9, %s7249_s14 }
 0x5d0   :  { %p6766_p5 = pnand %p6764_p4, %p6761_p3 }
 0x5d2   :  { %6769 = shalt.err (!%p6766_p5)
}
 0x5d3   :  { %4854 = dma.vmem_to_hbm [thread:$0]  %s4852_s13, 32, %s7249_s14, [#allocation4]  }
 0x5d4   :  { %6784 = dma.done.wait [#allocation4], 32  }
 0x5d5   :  { %6785 = vsyncadd [#allocation4], 4294967264 }
 0x5d6   :  { %4860 = vsyncpa [#allocation3], 1 }
 0x5d7   :  { %4861 = vsyncpa [#allocation6], 1 }
 0x5d8   :  { %4862 = vsyncpa [#allocation9], 1 }
 0x5d9   :  { %4863 = vsyncpa [#allocation12], 1 }
 0x5da   :  { %4864 = vsyncpa [#allocation15], 1 }
 0x5db   :  { %4865 = vsyncpa [#allocation18], 1 }
 0x5dc   :  { %4866 = vsyncpa [#allocation21], 1 }
 0x5dd   :  { %4867 = vsyncpa [#allocation4], 1 }

</bundles_post_ra>
